<compile_context>
chip_gen: v7x
topology: tpu7x:2x2x1
jax: 0.10.0
libtpu: 0.0.40
codegen_flags: <defaults>
</compile_context>

<pallas_src>
import jax
import jax.numpy as jnp
from jax.experimental import pallas as pl
from jax.experimental.pallas import tpu as pltpu


def _round_up(x: int, m: int) -> int:
    return ((x + m - 1) // m) * m


def _cdiv(a: int, b: int) -> int:
    return -(-a // b)


def _choose_tk(d_in_128: int, tk_max: int) -> int:
    """Pick the K tile: as large as allowed (amortizes ~0.35us/step overhead)
    while minimizing dead padded-K rows that would be DMA'd + MXU'd for free.
    Cost model in 'weight rows': one grid step ~ 0.35us ~ 224 rows of bf16
    weight DMA at ~1.3 TB/s; each padded K row is one wasted DMA'd row."""
    STEP_COST_ROWS = 224
    hi = min(_round_up(tk_max, 128), d_in_128)
    best_tk, best_cost = 128, None
    for tk in range(128, hi + 1, 128):
        n_steps = _cdiv(d_in_128, tk)
        waste = n_steps * tk - d_in_128
        cost = n_steps * STEP_COST_ROWS + waste
        if best_cost is None or cost < best_cost or (cost == best_cost and tk > best_tk):
            best_tk, best_cost = tk, cost
    return best_tk


def _make_kernel(fuse_head_epilogue: bool):
    """Fused forward kernel factory.

    Grid = (M tiles, N splits, K tiles); K is the reduction axis ("arbitrary").

    x_ref  : [tm, tk]         bf16  flattened-input tile
    wn_ref : [tk, dn_split]   bf16  backbone ("Net") weight K-slab (N split)
    bn_ref : [1,  dn_split]   f32   backbone bias slice (padded cols = 0)
    whT_ref: [1,  dn_split]   f32   head Linear(1000,1) weight row slice (pad=0)
    bh_ref : [1, 1]           f32   head bias (SMEM scalar)
    o_ref  : [tm, 128]        f32   lane-dense output slab for this N split
    acc_ref: [tm, dn_split]   f32   VMEM accumulator scratch
    """

    def kernel(x_ref, wn_ref, bn_ref, whT_ref, bh_ref, o_ref, acc_ref):
        k = pl.program_id(2)

        @pl.when(k == 0)
        def _():
            acc_ref[...] = jnp.zeros_like(acc_ref)

        # MXU: bf16 inputs, f32 accumulation.
        acc_ref[...] += jnp.dot(x_ref[...], wn_ref[...],
                                preferred_element_type=jnp.float32)

        @pl.when(k == pl.num_programs(2) - 1)
        def _():
            # Epilogue (once per (M tile, N split)): bias, head lane-reduction.
            feats = acc_ref[...] + bn_ref[...]                   # [tm, dn] f32
            # Head Linear(1000,1) as a VPU/XLU lane reduction (not an N=1 MXU
            # matmul); padded lanes multiply by zero head weights -> no leak.
            partial = jnp.sum(feats * whT_ref[...], axis=-1, keepdims=True)
            if fuse_head_epilogue:
                # Single N split: finish in-kernel (head bias + sigmoid on EUP).
                partial = jax.nn.sigmoid(partial + bh_ref[0, 0])
            # Lane-dense store: broadcast the scalar across 128 lanes.
            o_ref[...] = jnp.broadcast_to(partial, o_ref.shape)

    return kernel


def prepare_myenet(w_net, b_net, w_head, b_head, *, tk_max=2048):
    """One-time weight preparation (review item 1): pad + cast OUTSIDE the hot
    per-call path.  Returns (params arrays, static plan)."""
    D_in, D_net = w_net.shape
    D_net_pad = _round_up(D_net, 128)          # 1000 -> 1024: lane-dense feats
    d_in_128 = _round_up(D_in, 128)            # pad K only to 128...
    tk = _choose_tk(d_in_128, tk_max)          # ...then pick tk with min waste
    D_in_pad = _round_up(d_in_128, tk)

    wn_p = jnp.zeros((D_in_pad, D_net_pad), jnp.bfloat16)
    wn_p = wn_p.at[:D_in, :D_net].set(w_net.astype(jnp.bfloat16))
    bn_p = jnp.zeros((1, D_net_pad), jnp.float32)
    bn_p = bn_p.at[:, :D_net].set(b_net.astype(jnp.float32).reshape(1, D_net))
    whT_p = jnp.zeros((1, D_net_pad), jnp.float32)
    whT_p = whT_p.at[:, :D_net].set(w_head.astype(jnp.float32).reshape(1, D_net))
    bh = b_head.astype(jnp.float32).reshape(1, 1)

    params = {"wn": wn_p, "bn": bn_p, "wh": whT_p, "bh": bh}
    plan = {"d_in": int(D_in), "d_in_pad": int(D_in_pad),
            "d_net_pad": int(D_net_pad), "tk": int(tk)}
    return params, plan


def myenet_forward(x_nchw, params, plan, *, n_splits=1):
    """x_nchw: [B, C, H, W]; params/plan from prepare_myenet().
    n_splits: set to 2 on v7x for small batches (B <= tm) so both TensorCores
    get a "parallel" grid axis; keep 1 on single-TC chips (v5e/v6e).
    Returns [B, 1] f32 probabilities."""
    d_in = plan["d_in"]
    d_in_pad = plan["d_in_pad"]
    d_net_pad = plan["d_net_pad"]
    tk = plan["tk"]
    assert d_net_pad % (128 * n_splits) == 0, "n_splits must divide 1024/128"
    dn_split = d_net_pad // n_splits

    B = x_nchw.shape[0]
    x_flat = x_nchw.reshape(B, -1).astype(jnp.bfloat16)   # glue: flatten NCHW
    assert x_flat.shape[1] == d_in, "input width does not match prepared w_net"

    # ---- batch tiling: tm up to 256 so w_net is re-streamed fewer times -----
    B_pad = _round_up(max(B, 16), 16)          # bf16 sublane-pack friendly rows
    n_m_tiles = _cdiv(B_pad, 256)              # cap tm at 256 (v7x VMEM budget)
    tm = _round_up(_cdiv(B_pad, n_m_tiles), 16)
    B_pad = _round_up(B_pad, tm)

    # Per-call activation pad only (weights already padded in prepare_myenet).
    x_p = jnp.zeros((B_pad, d_in_pad), jnp.bfloat16).at[:B, :d_in].set(x_flat)

    grid = (B_pad // tm, n_splits, d_in_pad // tk)

    # ---- VMEM budget (re-derived so it also fits v7x's 64 MiB physical) -----
    vmem_need = (2 * tk * dn_split * 2         # double-buffered w_net slabs
                 + 2 * tm * tk * 2             # double-buffered x tiles
                 + tm * dn_split * 4           # f32 accumulator scratch
                 + 2 * tm * 128 * 4            # output double buffer
                 + (2 << 20))                  # bn/wh/bh + misc headroom
    vmem_limit = min(max(int(vmem_need * 1.25), 32 << 20), 56 << 20)

    out = pl.pallas_call(
        _make_kernel(fuse_head_epilogue=(n_splits == 1)),
        out_shape=jax.ShapeDtypeStruct((B_pad, n_splits * 128), jnp.float32),
        grid_spec=pltpu.PrefetchScalarGridSpec(
            num_scalar_prefetch=0,
            grid=grid,
            in_specs=[
                pl.BlockSpec((tm, tk), lambda i, n, k: (i, k)),          # x
                pl.BlockSpec((tk, dn_split), lambda i, n, k: (k, n)),    # w_net
                pl.BlockSpec((1, dn_split), lambda i, n, k: (0, n)),     # b_net
                pl.BlockSpec((1, dn_split), lambda i, n, k: (0, n)),     # w_head
                pl.BlockSpec(memory_space=pltpu.MemorySpace.SMEM),       # b_head
            ],
            out_specs=pl.BlockSpec((tm, 128), lambda i, n, k: (i, n)),
            scratch_shapes=[pltpu.VMEM((tm, dn_split), jnp.float32)],
        ),
        compiler_params=pltpu.CompilerParams(
            dimension_semantics=("parallel", "parallel", "arbitrary"),
            vmem_limit_bytes=vmem_limit),
    )(x_p, params["wn"], params["bn"], params["wh"], params["bh"])

    if n_splits == 1:
        # Kernel already applied head bias + sigmoid.  Padded batch rows
        # (B..B_pad) are discarded here — never alias/accumulate into them.
        return out[:B, :1]
    # Combine per-split partial head sums; add head bias once; sigmoid.
    partials = out[:B].reshape(B, n_splits, 128)[:, :, 0]      # [B, n_splits]
    logits = jnp.sum(partials, axis=1, keepdims=True) + params["bh"]
    return jax.nn.sigmoid(logits)


def _reference_f32(x_nchw, w_net, b_net, w_head, b_head):
    B = x_nchw.shape[0]
    x_flat = x_nchw.reshape(B, -1).astype(jnp.float32)
    feats = x_flat @ w_net + b_net
    logits = feats @ w_head + b_head
    return jax.nn.sigmoid(logits)


def _reference_bf16_inputs(x_nchw, w_net, b_net, w_head, b_head):
    # Mirrors the kernel's numerics: bf16-rounded x / w_net, f32 accumulation.
    B = x_nchw.shape[0]
    xq = x_nchw.reshape(B, -1).astype(jnp.bfloat16).astype(jnp.float32)
    wq = w_net.astype(jnp.bfloat16).astype(jnp.float32)
    feats = jnp.dot(xq, wq, precision=jax.lax.Precision.HIGHEST) + b_net
    logits = jnp.dot(feats, w_head, precision=jax.lax.Precision.HIGHEST) + b_head
    return jax.nn.sigmoid(logits)


if __name__ == "__main__":
    # Small deterministic shapes consistent with the forward pass:
    # batch=2, channels=4, spatial=16x16 -> 1024 flattened features,
    # backbone output = 1000 (implied by nn.Linear(1000, 1)).
    B, C, H, W = 2, 4, 16, 16
    D_IN = C * H * W          # 1024
    D_NET = 1000              # backbone output width
    D_OUT = 1

    key = jax.random.PRNGKey(0)
    kx, kwn, kbn, kwh, kbh = jax.random.split(key, 5)

    x = jax.random.normal(kx, (B, C, H, W), dtype=jnp.float32)

    # PyTorch-Linear-style init: U(-1/sqrt(fan_in), 1/sqrt(fan_in)).
    bound_net = float(D_IN) ** -0.5
    w_net = jax.random.uniform(kwn, (D_IN, D_NET), jnp.float32,
                               -bound_net, bound_net)
    b_net = jax.random.uniform(kbn, (1, D_NET), jnp.float32,
                               -bound_net, bound_net)

    bound_head = float(D_NET) ** -0.5
    w_head = jax.random.uniform(kwh, (D_NET, D_OUT), jnp.float32,
                                -bound_head, bound_head)
    b_head = jax.random.uniform(kbh, (1, D_OUT), jnp.float32,
                                -bound_head, bound_head)

    # One-time weight prep (hoisted pad + bf16 cast), then jit the per-call
    # path so the x pad/cast + tiny epilogue fuse around the Pallas kernel.
    params, plan = prepare_myenet(w_net, b_net, w_head, b_head)
    fwd = jax.jit(lambda xx, pp: myenet_forward(xx, pp, plan, n_splits=1))
    fwd_split = jax.jit(lambda xx, pp: myenet_forward(xx, pp, plan, n_splits=2))

    out = jax.block_until_ready(fwd(x, params))            # default path
    out2 = jax.block_until_ready(fwd_split(x, params))     # v7x small-batch path
    assert out.shape == (B, 1)
    assert out2.shape == (B, 1)

    # Tight check against a reference with the same bf16 input quantization.
    ref_q = _reference_bf16_inputs(x, w_net, b_net, w_head, b_head)
    assert jnp.allclose(out, ref_q, atol=2e-3, rtol=2e-3), (out, ref_q)
    assert jnp.allclose(out2, ref_q, atol=2e-3, rtol=2e-3), (out2, ref_q)

    # Loose check against the pure-f32 reference (bf16 weight quantization).
    ref_f32 = _reference_f32(x, w_net, b_net, w_head, b_head)
    assert jnp.allclose(out, ref_f32, atol=3e-2, rtol=3e-2), (out, ref_f32)
    assert jnp.allclose(out2, ref_f32, atol=3e-2, rtol=3e-2), (out2, ref_f32)

    print("KERNEL_OK")
</pallas_src>

<mosaic_0001>
module attributes {stable_mosaic.version = 11 : i64} {
  func.func @kernel(%arg0: i32, %arg1: i32, %arg2: i32, %arg3: memref<16x1024xbf16, #tpu.memory_space<vmem>>, %arg4: memref<1024x1024xbf16, #tpu.memory_space<vmem>>, %arg5: memref<1x1024xf32, #tpu.memory_space<vmem>>, %arg6: memref<1x1024xf32, #tpu.memory_space<vmem>>, %arg7: memref<1x1xf32, #tpu.memory_space<smem>>, %arg8: memref<16x128xf32, #tpu.memory_space<vmem>>, %arg9: memref<16x1024xf32, #tpu.memory_space<vmem>>) attributes {dimension_semantics = [#tpu.dimension_semantics<parallel>, #tpu.dimension_semantics<parallel>, #tpu.dimension_semantics<arbitrary>], iteration_bounds = array<i64: 1, 1, 1>, scalar_prefetch = 0 : i64, scratch_operands = 1 : i64, tpu.core_type = #tpu.core_type<tc>, window_params = [{transform_indices = @transform_0, window_bounds = array<i64: 16, 1024>}, {transform_indices = @transform_1, window_bounds = array<i64: 1024, 1024>}, {transform_indices = @transform_2, window_bounds = array<i64: 1, 1024>}, {transform_indices = @transform_3, window_bounds = array<i64: 1, 1024>}, {transform_indices = @transform_4, window_bounds = array<i64: 1, 1>}, {transform_indices = @transform_5, window_bounds = array<i64: 16, 128>}]} {
    %c0_i32 = arith.constant 0 : i32
    %0 = arith.cmpi eq, %arg2, %c0_i32 : i32
    %1 = arith.extui %0 : i1 to i32
    %c0_i32_0 = arith.constant 0 : i32
    %2 = arith.cmpi ne, %1, %c0_i32_0 : i32
    scf.if %2 {
      %cst_10 = arith.constant 0.000000e+00 : f32
      %12 = vector.broadcast %cst_10 : f32 to vector<16x1024xf32>
      %c0_11 = arith.constant 0 : index
      %c0_12 = arith.constant 0 : index
      %13 = vector.load %arg9[%c0_11, %c0_12] : memref<16x1024xf32, #tpu.memory_space<vmem>>, vector<16x1024xf32>
      tpu.vector_store %arg9[%c0_11, %c0_12], %12 {strides = array<i32>} : memref<16x1024xf32, #tpu.memory_space<vmem>>, vector<16x1024xf32>,
    } else {
    }
    %c0 = arith.constant 0 : index
    %c0_1 = arith.constant 0 : index
    %3 = vector.load %arg9[%c0, %c0_1] : memref<16x1024xf32, #tpu.memory_space<vmem>>, vector<16x1024xf32>
    %c0_2 = arith.constant 0 : index
    %c0_3 = arith.constant 0 : index
    %4 = vector.load %arg3[%c0_2, %c0_3] : memref<16x1024xbf16, #tpu.memory_space<vmem>>, vector<16x1024xbf16>
    %c0_4 = arith.constant 0 : index
    %c0_5 = arith.constant 0 : index
    %5 = vector.load %arg4[%c0_4, %c0_5] : memref<1024x1024xbf16, #tpu.memory_space<vmem>>, vector<1024x1024xbf16>
    %cst = arith.constant dense<0.000000e+00> : vector<16x1024xf32>
    %6 = tpu.matmul %4, %5, %cst {dimension_numbers = #tpu.dot_dimension_numbers<[1], [0], [0], [1], [0, 0, 1, 1], [], []>} : vector<16x1024xbf16>, vector<1024x1024xbf16>, vector<16x1024xf32> -> vector<16x1024xf32>
    %7 = arith.addf %3, %6 : vector<16x1024xf32>
    %c0_6 = arith.constant 0 : index
    %c0_7 = arith.constant 0 : index
    %8 = vector.load %arg9[%c0_6, %c0_7] : memref<16x1024xf32, #tpu.memory_space<vmem>>, vector<16x1024xf32>
    tpu.vector_store %arg9[%c0_6, %c0_7], %7 {strides = array<i32>} : memref<16x1024xf32, #tpu.memory_space<vmem>>, vector<16x1024xf32>,
    %c0_i32_8 = arith.constant 0 : i32
    %9 = arith.cmpi eq, %arg2, %c0_i32_8 : i32
    %10 = arith.extui %9 : i1 to i32
    %c0_i32_9 = arith.constant 0 : i32
    %11 = arith.cmpi ne, %10, %c0_i32_9 : i32
    scf.if %11 {
      %c0_10 = arith.constant 0 : index
      %c0_11 = arith.constant 0 : index
      %12 = vector.load %arg9[%c0_10, %c0_11] : memref<16x1024xf32, #tpu.memory_space<vmem>>, vector<16x1024xf32>
      %c0_12 = arith.constant 0 : index
      %c0_13 = arith.constant 0 : index
      %13 = vector.load %arg5[%c0_12, %c0_13] : memref<1x1024xf32, #tpu.memory_space<vmem>>, vector<1x1024xf32>
      %14 = vector.broadcast %13 : vector<1x1024xf32> to vector<16x1024xf32>
      %15 = arith.addf %12, %14 : vector<16x1024xf32>
      %c0_14 = arith.constant 0 : index
      %c0_15 = arith.constant 0 : index
      %16 = vector.load %arg6[%c0_14, %c0_15] : memref<1x1024xf32, #tpu.memory_space<vmem>>, vector<1x1024xf32>
      %17 = vector.broadcast %16 : vector<1x1024xf32> to vector<16x1024xf32>
      %18 = arith.mulf %15, %17 : vector<16x1024xf32>
      %cst_16 = arith.constant dense<0.000000e+00> : vector<16xf32>
      %19 = vector.multi_reduction <add>, %18, %cst_16 [1] : vector<16x1024xf32> to vector<16xf32>
      %20 = vector.shape_cast %19 : vector<16xf32> to vector<16x1xf32>
      %c0_17 = arith.constant 0 : index
      %c0_18 = arith.constant 0 : index
      %21 = memref.load %arg7[%c0_17, %c0_18] : memref<1x1xf32, #tpu.memory_space<smem>>
      %22 = vector.broadcast %21 : f32 to vector<16x1xf32>
      %23 = arith.addf %20, %22 : vector<16x1xf32>
      %24 = arith.negf %23 : vector<16x1xf32>
      %25 = math.exp %24 : vector<16x1xf32>
      %cst_19 = arith.constant 1.000000e+00 : f32
      %26 = vector.broadcast %cst_19 : f32 to vector<16x1xf32>
      %27 = arith.addf %26, %25 : vector<16x1xf32>
      %28 = arith.divf %26, %27 : vector<16x1xf32>
      %29 = vector.shape_cast %28 : vector<16x1xf32> to vector<16x1xf32>
      %30 = vector.broadcast %29 : vector<16x1xf32> to vector<16x128xf32>
      %c0_20 = arith.constant 0 : index
      %c0_21 = arith.constant 0 : index
      %31 = vector.load %arg8[%c0_20, %c0_21] : memref<16x128xf32, #tpu.memory_space<vmem>>, vector<16x128xf32>
      tpu.vector_store %arg8[%c0_20, %c0_21], %30 {strides = array<i32>} : memref<16x128xf32, #tpu.memory_space<vmem>>, vector<16x128xf32>,
    } else {
    }
    return
  }
  func.func @transform_0(%arg0: i32, %arg1: i32, %arg2: i32) -> (i32, i32) {
    %c0_i32 = arith.constant 0 : i32
    return %arg0, %arg2 : i32, i32
  }
  func.func @transform_1(%arg0: i32, %arg1: i32, %arg2: i32) -> (i32, i32) {
    %c0_i32 = arith.constant 0 : i32
    return %arg2, %arg1 : i32, i32
  }
  func.func @transform_2(%arg0: i32, %arg1: i32, %arg2: i32) -> (i32, i32) {
    %c0_i32 = arith.constant 0 : i32
    %c0_i32_0 = arith.constant 0 : i32
    return %c0_i32, %arg1 : i32, i32
  }
  func.func @transform_3(%arg0: i32, %arg1: i32, %arg2: i32) -> (i32, i32) {
    %c0_i32 = arith.constant 0 : i32
    %c0_i32_0 = arith.constant 0 : i32
    return %c0_i32, %arg1 : i32, i32
  }
  func.func @transform_4(%arg0: i32, %arg1: i32, %arg2: i32) -> (i32, i32) {
    %c0_i32 = arith.constant 0 : i32
    %c0_i32_0 = arith.constant 0 : i32
    %c0_i32_1 = arith.constant 0 : i32
    return %c0_i32, %c0_i32_0 : i32, i32
  }
  func.func @transform_5(%arg0: i32, %arg1: i32, %arg2: i32) -> (i32, i32) {
    %c0_i32 = arith.constant 0 : i32
    return %arg0, %arg1 : i32, i32
  }
}

</mosaic_0001>

<bundles_post_ra>
// kernel: _lambda_.1
= control target key start
LH: loop header
LB: loop body
LE: loop exit
PB: predicated region body
PF: predicated region fallthrough
CT: control target
= control target key end

     0   :  { %11 = vsyncpa [#allocation5], 0  ;;  %s4995_s0 = inlined_call_operand.vmem [shape: bf16[16,1024], index: 0, kind: input, shape index: {}]   ;;  %s4996_s1 = inlined_call_operand.hbm [shape: bf16[1024,1024], index: 1, kind: input, shape index: {}]   ;;  %s4997_s2 = inlined_call_operand.hbm [shape: f32[1,1024], index: 2, kind: input, shape index: {}]   ;;  %s4998_s3 = inlined_call_operand.hbm [shape: f32[1,1024], index: 3, kind: input, shape index: {}]   ;;  %s4999_s4 = inlined_call_operand.<no memory space> [shape: f32[1,1], index: 4, kind: input, shape index: {}]   ;;  %s5000_s5 = inlined_call_operand.vmem [shape: f32[16,128], index: 5, kind: output, shape index: {}]  }
   0x1   :  { %12 = vsyncpa [#allocation7], 0  ;;  %s4764_s18 = smov [#allocation6]   ;;  %s4765_s20 = smov [#allocation4]  }
   0x2   :  { %s33_s19 = sshll.u32 %s4764_s18, 4  ;;  %s20_s21 = sshll.u32 %s4765_s20, 4  ;;  %s34_s19 = int_to_ptr.vmem [resolvable:$true] %s33_s19  ;;  %s4799_s21 = int_to_ptr.vmem [resolvable:$true] %s20_s21 }
   0x3   :  { %s4694_s24 = scalar_lea.hbm %s4997_s2, 128 }
   0x4   :  { %p4695_p0 = scmp.ne.s32.totalorder %s4997_s2, %s4694_s24  ;;  %p4698_p1 = scmp.lt.u32.totalorder %s4694_s24, %s4997_s2 }
   0x6   :  { %p4700_p2 = pnand %p4698_p1, %p4695_p0 }
   0x8   :  { %4703 = shalt.err (!%p4700_p2)
}
   0x9   :  { %s4704_s29 = scalar_lea.vmem %s34_s19, 128  ;;  %p4709_p4 = scmp.lt.s32.totalorder %s34_s19, %s34_s19 }
   0xa   :  { %p4705_p3 = scmp.ne.s32.totalorder %s34_s19, %s4704_s29  ;;  %p4710_p5 = scmp.lt.s32.totalorder %s4704_s29, %s4704_s29 }
   0xc   :  { %p4711_p6 = por %p4710_p5, %p4709_p4 }
   0xe   :  { %p4712_p7 = pnand %p4711_p6, %p4705_p3 }
  0x10   :  { %4715 = shalt.err (!%p4712_p7)
}
  0x11   :  { %36 = dma.hbm_to_vmem [thread:$0]  %s4997_s2, 128, %s34_s19, [#allocation7]  }
  0x12   :  { %s4716_s9 = scalar_lea.hbm %s4996_s1, 65536 }
  0x13   :  { %p4717_p8 = scmp.ne.s32.totalorder %s4996_s1, %s4716_s9  ;;  %p4720_p9 = scmp.lt.u32.totalorder %s4716_s9, %s4996_s1 }
  0x15   :  { %p4722_p10 = pnand %p4720_p9, %p4717_p8 }
  0x17   :  { %4725 = shalt.err (!%p4722_p10)
}
  0x18   :  { %s4726_s14 = scalar_lea.vmem %s4799_s21, 65536  ;;  %p4731_p12 = scmp.lt.s32.totalorder %s4799_s21, %s4799_s21 }
  0x19   :  { %p4727_p11 = scmp.ne.s32.totalorder %s4799_s21, %s4726_s14  ;;  %p4732_p13 = scmp.lt.s32.totalorder %s4726_s14, %s4726_s14 }
  0x1b   :  { %p4733_p0 = por %p4732_p13, %p4731_p12 }
  0x1d   :  { %p4734_p1 = pnand %p4733_p0, %p4727_p11 }
  0x1f   :  { %4737 = shalt.err (!%p4734_p1)
}
  0x20   :  { %s4766_s2 = smov 512   ;;  %s4767_s15 = smov 32  }
  0x21   :  { %26 = dma.hbm_to_vmem [thread:$0]  %s4996_s1, 65536, %s4799_s21, [#allocation5], %s4766_s2, %s4766_s2, %s4767_s15  }
  0x22   :  { %s4768_s18 = smov [#allocation8]   ;;  %s4738_s23 = scalar_lea.hbm %s4998_s3, 128 }
  0x23   :  { %s43_s19 = sshll.u32 %s4768_s18, 4  ;;  %p4739_p2 = scmp.ne.s32.totalorder %s4998_s3, %s4738_s23  ;;  %s44_s19 = int_to_ptr.vmem [resolvable:$true] %s43_s19 }
  0x24   :  { %p4742_p3 = scmp.lt.u32.totalorder %s4738_s23, %s4998_s3 }
  0x26   :  { %p4744_p4 = pnand %p4742_p3, %p4739_p2 }
  0x28   :  { %4747 = shalt.err (!%p4744_p4)
}
  0x29   :  { %s4748_s28 = scalar_lea.vmem %s44_s19, 128  ;;  %p4753_p6 = scmp.lt.s32.totalorder %s44_s19, %s44_s19 }
  0x2a   :  { %p4749_p5 = scmp.ne.s32.totalorder %s44_s19, %s4748_s28  ;;  %p4754_p7 = scmp.lt.s32.totalorder %s4748_s28, %s4748_s28 }
  0x2c   :  { %p4755_p8 = por %p4754_p7, %p4753_p6 }
  0x2e   :  { %p4756_p9 = pnand %p4755_p8, %p4749_p5 }
  0x30   :  { %4759 = shalt.err (!%p4756_p9)
}
  0x31   :  { %46 = dma.hbm_to_vmem [thread:$0]  %s4998_s3, 128, %s44_s19, [#allocation7]  }
  0x32   :  { %4760 = dma.done.wait [#allocation5], 65536  }
  0x33   :  { %4761 = vsyncadd [#allocation5], 4294901760 }
  0x34   :  { %4762 = dma.done.wait [#allocation7], 256  }
  0x35   :  { %4763 = vsyncadd [#allocation7], 4294967040  ;;  %v102_v0 = vld [vmem:[#allocation4] sm:$0xff]  ;;  %v103_v2 = vld [vmem:[#allocation4 + $0x8] sm:$0xff] }
  0x36   :  { %v106_v1 = vld [vmem:[#allocation4 + $0x20] sm:$0xff]  ;;  %v107_v4 = vld [vmem:[#allocation4 + $0x28] sm:$0xff] }
  0x37   :  { %v4120_v3 = vcombine.high %v102_v0, %v106_v1  ;;  %v4119_v5 = vcombine.low %v102_v0, %v106_v1  ;;  %v110_v6 = vld [vmem:[#allocation4 + $0x40] sm:$0xff]  ;;  %v4122_v8 = vcombine.high %v103_v2, %v107_v4  ;;  %v4121_v9 = vcombine.low %v103_v2, %v107_v4  ;;  %v111_v11 = vld [vmem:[#allocation4 + $0x48] sm:$0xff] }
  0x38   :  { %v114_v7 = vld [vmem:[#allocation4 + $0x60] sm:$0xff]  ;;  %v115_v12 = vld [vmem:[#allocation4 + $0x68] sm:$0xff] }
  0x39   :  { %v4128_v10 = vcombine.high %v110_v6, %v114_v7  ;;  %v118_v13 = vld [vmem:[#allocation4 + $0x80] sm:$0xff]  ;;  %3214 = vmatprep.subr.bf16.mxu0 %v4120_v3  ;;  %v4130_v14 = vcombine.high %v111_v11, %v115_v12  ;;  %v119_v16 = vld [vmem:[#allocation4 + $0x88] sm:$0xff]  ;;  %3386 = vmatprep.subr.bf16.mxu1 %v4122_v8  ;;  %v4127_v18 = vcombine.low %v110_v6, %v114_v7 }
  0x3a   :  { %v122_v15 = vld [vmem:[#allocation4 + $0xa0] sm:$0xff]  ;;  %v123_v17 = vld [vmem:[#allocation4 + $0xa8] sm:$0xff]  ;;  %3215 = vmatpush1.bf16.msra.mxu0 %v4119_v5  ;;  %3387 = vmatpush1.bf16.msra.mxu1 %v4121_v9  ;;  %v4129_v19 = vcombine.low %v111_v11, %v115_v12 }
  0x3b   :  { %3216 = vmatprep.subr.bf16.mxu0 %v4128_v10  ;;  %v4136_v20 = vcombine.high %v118_v13, %v122_v15  ;;  %3388 = vmatprep.subr.bf16.mxu1 %v4130_v14  ;;  %v4138_v21 = vcombine.high %v119_v16, %v123_v17  ;;  %v126_v22 = vld [vmem:[#allocation4 + $0xc0] sm:$0xff]  ;;  %v127_v24 = vld [vmem:[#allocation4 + $0xc8] sm:$0xff]  ;;  %v4135_v26 = vcombine.low %v118_v13, %v122_v15 }
  0x3c   :  { %v130_v23 = vld [vmem:[#allocation4 + $0xe0] sm:$0xff]  ;;  %v131_v25 = vld [vmem:[#allocation4 + $0xe8] sm:$0xff]  ;;  %v4137_v27 = vcombine.low %v119_v16, %v123_v17 }
  0x3d   :  { %v4144_v28 = vcombine.high %v126_v22, %v130_v23  ;;  %v4146_v29 = vcombine.high %v127_v24, %v131_v25  ;;  %v134_v30 = vld [vmem:[#allocation4 + $0x100] sm:$0xff]  ;;  %v135_v32 = vld [vmem:[#allocation4 + $0x108] sm:$0xff]  ;;  %v4143_v34 = vcombine.low %v126_v22, %v130_v23  ;;  %v4145_v35 = vcombine.low %v127_v24, %v131_v25 }
  0x3e   :  { %3217 = vmatpush1.bf16.msra.mxu0 %v4127_v18  ;;  %3389 = vmatpush1.bf16.msra.mxu1 %v4129_v19  ;;  %v138_v31 = vld [vmem:[#allocation4 + $0x120] sm:$0xff]  ;;  %v139_v33 = vld [vmem:[#allocation4 + $0x128] sm:$0xff] }
  0x3f   :  { %3218 = vmatprep.subr.bf16.mxu0 %v4136_v20  ;;  %3390 = vmatprep.subr.bf16.mxu1 %v4138_v21  ;;  %v4152_v36 = vcombine.high %v134_v30, %v138_v31  ;;  %v4154_v37 = vcombine.high %v135_v32, %v139_v33  ;;  %v142_v38 = vld [vmem:[#allocation4 + $0x140] sm:$0xff]  ;;  %v143_v40 = vld [vmem:[#allocation4 + $0x148] sm:$0xff]  ;;  %v4151_v42 = vcombine.low %v134_v30, %v138_v31 }
  0x40   :  { %v146_v39 = vld [vmem:[#allocation4 + $0x160] sm:$0xff]  ;;  %v147_v41 = vld [vmem:[#allocation4 + $0x168] sm:$0xff]  ;;  %v4153_v43 = vcombine.low %v135_v32, %v139_v33 }
  0x41   :  { %v4160_v44 = vcombine.high %v142_v38, %v146_v39  ;;  %v4162_v45 = vcombine.high %v143_v40, %v147_v41  ;;  %v150_v46 = vld [vmem:[#allocation4 + $0x180] sm:$0xff]  ;;  %v151_v48 = vld [vmem:[#allocation4 + $0x188] sm:$0xff]  ;;  %v4159_v50 = vcombine.low %v142_v38, %v146_v39  ;;  %v4161_v51 = vcombine.low %v143_v40, %v147_v41 }
  0x42   :  { %3219 = vmatpush1.bf16.msra.mxu0 %v4135_v26  ;;  %3391 = vmatpush1.bf16.msra.mxu1 %v4137_v27  ;;  %v154_v47 = vld [vmem:[#allocation4 + $0x1a0] sm:$0xff]  ;;  %v155_v49 = vld [vmem:[#allocation4 + $0x1a8] sm:$0xff] }
  0x43   :  { %3220 = vmatprep.subr.bf16.mxu0 %v4144_v28  ;;  %3392 = vmatprep.subr.bf16.mxu1 %v4146_v29  ;;  %v4168_v52 = vcombine.high %v150_v46, %v154_v47  ;;  %v4845_v53 = vld [vmem:[%s4995_s0] sm:$0xff]  ;;  %v4170_v55 = vcombine.high %v151_v48, %v155_v49  ;;  %v159_v59 = vld [vmem:[#allocation4 + $0x1c8] sm:$0xff]  ;;  %v4167_v61 = vcombine.low %v150_v46, %v154_v47 }
  0x44   :  { %v4850_v54 = vld [vmem:[%s4995_s0 + $0x20] sm:$0xff]  ;;  %v163_v60 = vld [vmem:[#allocation4 + $0x1e8] sm:$0xff]  ;;  %v4169_v62 = vcombine.low %v151_v48, %v155_v49 }
  0x45   :  { %v158_v56 = vld [vmem:[#allocation4 + $0x1c0] sm:$0xff]  ;;  %v4854_v58 = vcombine.high %v4845_v53, %v4850_v54  ;;  %v4178_v0 = vcombine.high %v159_v59, %v163_v60  ;;  %v167_v3 = vld [vmem:[#allocation4 + $0x208] sm:$0xff]  ;;  %v4177_v6 = vcombine.low %v159_v59, %v163_v60 }
  0x46   :  { %3221 = vmatpush1.bf16.msra.mxu0 %v4143_v34  ;;  %3393 = vmatpush1.bf16.msra.mxu1 %v4145_v35  ;;  %v162_v57 = vld [vmem:[#allocation4 + $0x1e0] sm:$0xff]  ;;  %v171_v4 = vld [vmem:[#allocation4 + $0x228] sm:$0xff] }
  0x47   :  { %3222 = vmatprep.subr.bf16.mxu0 %v4152_v36  ;;  %3394 = vmatprep.subr.bf16.mxu1 %v4154_v37  ;;  %v4176_v63 = vcombine.high %v158_v56, %v162_v57  ;;  %v166_v1 = vld [vmem:[#allocation4 + $0x200] sm:$0xff]  ;;  %v4175_v5 = vcombine.low %v158_v56, %v162_v57  ;;  %v4186_v8 = vcombine.high %v167_v3, %v171_v4  ;;  %v175_v11 = vld [vmem:[#allocation4 + $0x248] sm:$0xff] }
  0x48   :  { %3246 = vmatprep.mubr.bf16.mxu0 %v4854_v58  ;;  %v170_v2 = vld [vmem:[#allocation4 + $0x220] sm:$0xff]  ;;  %3418 = vmatprep.mubr.bf16.mxu1 %v4854_v58  ;;  %v179_v12 = vld [vmem:[#allocation4 + $0x268] sm:$0xff]  ;;  %v4185_v14 = vcombine.low %v167_v3, %v171_v4 }
  0x49   :  { %v4184_v7 = vcombine.high %v166_v1, %v170_v2  ;;  %v174_v9 = vld [vmem:[#allocation4 + $0x240] sm:$0xff]  ;;  %v4183_v13 = vcombine.low %v166_v1, %v170_v2  ;;  %v4194_v16 = vcombine.high %v175_v11, %v179_v12  ;;  %v183_v19 = vld [vmem:[#allocation4 + $0x288] sm:$0xff]  ;;  %v4193_v22 = vcombine.low %v175_v11, %v179_v12 }
  0x4a   :  { %3223 = vmatpush1.bf16.msra.mxu0 %v4151_v42  ;;  %3395 = vmatpush1.bf16.msra.mxu1 %v4153_v43  ;;  %v178_v10 = vld [vmem:[#allocation4 + $0x260] sm:$0xff]  ;;  %v187_v20 = vld [vmem:[#allocation4 + $0x2a8] sm:$0xff] }
  0x4b   :  { %3224 = vmatprep.subr.bf16.mxu0 %v4160_v44  ;;  %3396 = vmatprep.subr.bf16.mxu1 %v4162_v45  ;;  %v4192_v15 = vcombine.high %v174_v9, %v178_v10  ;;  %v182_v17 = vld [vmem:[#allocation4 + $0x280] sm:$0xff]  ;;  %v4191_v21 = vcombine.low %v174_v9, %v178_v10  ;;  %v4202_v24 = vcombine.high %v183_v19, %v187_v20  ;;  %v191_v27 = vld [vmem:[#allocation4 + $0x2c8] sm:$0xff] }
  0x4c   :  { %v186_v18 = vld [vmem:[#allocation4 + $0x2a0] sm:$0xff]  ;;  %v195_v28 = vld [vmem:[#allocation4 + $0x2e8] sm:$0xff]  ;;  %v4201_v30 = vcombine.low %v183_v19, %v187_v20 }
  0x4d   :  { %v4200_v23 = vcombine.high %v182_v17, %v186_v18  ;;  %v190_v25 = vld [vmem:[#allocation4 + $0x2c0] sm:$0xff]  ;;  %v4199_v29 = vcombine.low %v182_v17, %v186_v18  ;;  %v4210_v32 = vcombine.high %v191_v27, %v195_v28  ;;  %v199_v35 = vld [vmem:[#allocation4 + $0x308] sm:$0xff]  ;;  %v4209_v38 = vcombine.low %v191_v27, %v195_v28 }
  0x4e   :  { %3225 = vmatpush1.bf16.msra.mxu0 %v4159_v50  ;;  %3397 = vmatpush1.bf16.msra.mxu1 %v4161_v51  ;;  %v194_v26 = vld [vmem:[#allocation4 + $0x2e0] sm:$0xff]  ;;  %v203_v36 = vld [vmem:[#allocation4 + $0x328] sm:$0xff] }
  0x4f   :  { %3226 = vmatprep.subr.bf16.mxu0 %v4168_v52  ;;  %3398 = vmatprep.subr.bf16.mxu1 %v4170_v55  ;;  %v4208_v31 = vcombine.high %v190_v25, %v194_v26  ;;  %v198_v33 = vld [vmem:[#allocation4 + $0x300] sm:$0xff]  ;;  %v4207_v37 = vcombine.low %v190_v25, %v194_v26  ;;  %v4218_v40 = vcombine.high %v199_v35, %v203_v36  ;;  %v207_v43 = vld [vmem:[#allocation4 + $0x348] sm:$0xff] }
  0x50   :  { %v202_v34 = vld [vmem:[#allocation4 + $0x320] sm:$0xff]  ;;  %v211_v44 = vld [vmem:[#allocation4 + $0x368] sm:$0xff]  ;;  %v4217_v46 = vcombine.low %v199_v35, %v203_v36 }
  0x51   :  { %v4216_v39 = vcombine.high %v198_v33, %v202_v34  ;;  %v206_v41 = vld [vmem:[#allocation4 + $0x340] sm:$0xff]  ;;  %v4215_v45 = vcombine.low %v198_v33, %v202_v34  ;;  %v4226_v48 = vcombine.high %v207_v43, %v211_v44  ;;  %v215_v51 = vld [vmem:[#allocation4 + $0x388] sm:$0xff]  ;;  %v4225_v56 = vcombine.low %v207_v43, %v211_v44 }
  0x52   :  { %3227 = vmatpush1.bf16.msra.mxu0 %v4167_v61  ;;  %3399 = vmatpush1.bf16.msra.mxu1 %v4169_v62  ;;  %v210_v42 = vld [vmem:[#allocation4 + $0x360] sm:$0xff]  ;;  %v219_v52 = vld [vmem:[#allocation4 + $0x3a8] sm:$0xff] }
  0x53   :  { %3228 = vmatprep.subr.bf16.mxu0 %v4176_v63  ;;  %3400 = vmatprep.subr.bf16.mxu1 %v4178_v0  ;;  %v4224_v47 = vcombine.high %v206_v41, %v210_v42  ;;  %v214_v49 = vld [vmem:[#allocation4 + $0x380] sm:$0xff]  ;;  %v4223_v55 = vcombine.low %v206_v41, %v210_v42  ;;  %v4234_v59 = vcombine.high %v215_v51, %v219_v52  ;;  %v223_v62 = vld [vmem:[#allocation4 + $0x3c8] sm:$0xff] }
  0x54   :  { %v218_v50 = vld [vmem:[#allocation4 + $0x3a0] sm:$0xff]  ;;  %v227_v63 = vld [vmem:[#allocation4 + $0x3e8] sm:$0xff]  ;;  %v4233_v1 = vcombine.low %v215_v51, %v219_v52 }
  0x55   :  { %v4232_v57 = vcombine.high %v214_v49, %v218_v50  ;;  %v222_v60 = vld [vmem:[#allocation4 + $0x3c0] sm:$0xff]  ;;  %v4231_v0 = vcombine.low %v214_v49, %v218_v50  ;;  %v4242_v3 = vcombine.high %v223_v62, %v227_v63  ;;  %v4241_v9 = vcombine.low %v223_v62, %v227_v63  ;;  %v4865_v17 = vld [vmem:[%s4995_s0 + $0x8] sm:$0xff] }
  0x56   :  { %3229 = vmatpush1.bf16.msra.mxu0 %v4175_v5  ;;  %3401 = vmatpush1.bf16.msra.mxu1 %v4177_v6  ;;  %v226_v61 = vld [vmem:[#allocation4 + $0x3e0] sm:$0xff]  ;;  %v231_v6 = vld [vmem:[#allocation4 + $0x408] sm:$0xff] }
  0x57   :  { %3230 = vmatprep.subr.bf16.mxu0 %v4184_v7  ;;  %3402 = vmatprep.subr.bf16.mxu1 %v4186_v8  ;;  %v4240_v2 = vcombine.high %v222_v60, %v226_v61  ;;  %v230_v4 = vld [vmem:[#allocation4 + $0x400] sm:$0xff]  ;;  %v235_v7 = vld [vmem:[#allocation4 + $0x428] sm:$0xff]  ;;  %v4239_v8 = vcombine.low %v222_v60, %v226_v61 }
  0x58   :  { %v234_v5 = vld [vmem:[#allocation4 + $0x420] sm:$0xff]  ;;  %v4250_v11 = vcombine.high %v231_v6, %v235_v7  ;;  %v4870_v18 = vld [vmem:[%s4995_s0 + $0x28] sm:$0xff]  ;;  %v4249_v20 = vcombine.low %v231_v6, %v235_v7 }
  0x59   :  { %v4248_v10 = vcombine.high %v230_v4, %v234_v5  ;;  %v238_v12 = vld [vmem:[#allocation4 + $0x440] sm:$0xff]  ;;  %v4247_v19 = vcombine.low %v230_v4, %v234_v5  ;;  %v251_v25 = vld [vmem:[#allocation4 + $0x4a8] sm:$0xff] }
  0x5a   :  { %3231 = vmatpush1.bf16.msra.mxu0 %v4183_v13  ;;  %3403 = vmatpush1.bf16.msra.mxu1 %v4185_v14  ;;  %v242_v13 = vld [vmem:[#allocation4 + $0x460] sm:$0xff]  ;;  %v239_v14 = vld [vmem:[#allocation4 + $0x448] sm:$0xff] }
  0x5b   :  { %3232 = vmatprep.subr.bf16.mxu0 %v4192_v15  ;;  %3404 = vmatprep.subr.bf16.mxu1 %v4194_v16  ;;  %v4860_v15 = vcombine.low %v4845_v53, %v4850_v54  ;;  %v243_v16 = vld [vmem:[#allocation4 + $0x468] sm:$0xff]  ;;  %v246_v54 = vld [vmem:[#allocation4 + $0x480] sm:$0xff]  ;;  %v4255_v26 = vcombine.low %v238_v12, %v242_v13 }
  0x5c   :  { %v4258_v53 = vcombine.high %v239_v14, %v243_v16  ;;  %v4257_v27 = vcombine.low %v239_v14, %v243_v16  ;;  %v259_v33 = vld [vmem:[#allocation4 + $0x4e8] sm:$0xff] }
  0x5d   :  { %v267_v41 = vld [vmem:[#allocation4 + $0x528] sm:$0xff] }
  0x5e   :  { %3233 = vmatpush1.bf16.msra.mxu0 %v4191_v21  ;;  %3405 = vmatpush1.bf16.msra.mxu1 %v4193_v22  ;;  %v4256_v21 = vcombine.high %v238_v12, %v242_v13  ;;  %v250_v22 = vld [vmem:[#allocation4 + $0x4a0] sm:$0xff]  ;;  %v275_v49 = vld [vmem:[#allocation4 + $0x568] sm:$0xff] }
  0x5f   :  { %3234 = vmatprep.subr.bf16.mxu0 %v4200_v23  ;;  %3406 = vmatprep.subr.bf16.mxu1 %v4202_v24  ;;  %v4874_v23 = vcombine.high %v4865_v17, %v4870_v18  ;;  %v247_v24 = vld [vmem:[#allocation4 + $0x488] sm:$0xff]  ;;  %v4264_v28 = vcombine.high %v246_v54, %v250_v22  ;;  %v4263_v34 = vcombine.low %v246_v54, %v250_v22 }
  0x60   :  { %v4265_v35 = vcombine.low %v247_v24, %v251_v25  ;;  %v283_v60 = vld [vmem:[#allocation4 + $0x5a8] sm:$0xff] }
  0x61   :  { %v291_v4 = vld [vmem:[#allocation4 + $0x5e8] sm:$0xff] }
  0x62   :  { %3235 = vmatpush1.bf16.msra.mxu0 %v4199_v29  ;;  %3407 = vmatpush1.bf16.msra.mxu1 %v4201_v30  ;;  %v4266_v29 = vcombine.high %v247_v24, %v251_v25  ;;  %v254_v30 = vld [vmem:[#allocation4 + $0x4c0] sm:$0xff]  ;;  %v299_v12 = vld [vmem:[#allocation4 + $0x628] sm:$0xff] }
  0x63   :  { %3236 = vmatprep.subr.bf16.mxu0 %v4208_v31  ;;  %3408 = vmatprep.subr.bf16.mxu1 %v4210_v32  ;;  %v258_v31 = vld [vmem:[#allocation4 + $0x4e0] sm:$0xff]  ;;  %v255_v32 = vld [vmem:[#allocation4 + $0x4c8] sm:$0xff] }
  0x64   :  { %v4272_v36 = vcombine.high %v254_v30, %v258_v31  ;;  %v4271_v42 = vcombine.low %v254_v30, %v258_v31  ;;  %v4273_v43 = vcombine.low %v255_v32, %v259_v33  ;;  %v307_v54 = vld [vmem:[#allocation4 + $0x668] sm:$0xff] }
  0x65   :  { %v315_v30 = vld [vmem:[#allocation4 + $0x6a8] sm:$0xff] }
  0x66   :  { %3237 = vmatpush1.bf16.msra.mxu0 %v4207_v37  ;;  %3409 = vmatpush1.bf16.msra.mxu1 %v4209_v38  ;;  %v4274_v37 = vcombine.high %v255_v32, %v259_v33  ;;  %v262_v38 = vld [vmem:[#allocation4 + $0x500] sm:$0xff] }
  0x67   :  { %3238 = vmatprep.subr.bf16.mxu0 %v4216_v39  ;;  %3410 = vmatprep.subr.bf16.mxu1 %v4218_v40  ;;  %v266_v39 = vld [vmem:[#allocation4 + $0x520] sm:$0xff]  ;;  %v263_v40 = vld [vmem:[#allocation4 + $0x508] sm:$0xff] }
  0x68   :  { %v4280_v44 = vcombine.high %v262_v38, %v266_v39  ;;  %v4279_v50 = vcombine.low %v262_v38, %v266_v39  ;;  %v4281_v51 = vcombine.low %v263_v40, %v267_v41  ;;  %v323_v38 = vld [vmem:[#allocation4 + $0x6e8] sm:$0xff] }
  0x6a   :  { %3239 = vmatpush1.bf16.msra.mxu0 %v4215_v45  ;;  %3411 = vmatpush1.bf16.msra.mxu1 %v4217_v46  ;;  %v4282_v45 = vcombine.high %v263_v40, %v267_v41  ;;  %v270_v46 = vld [vmem:[#allocation4 + $0x540] sm:$0xff] }
  0x6b   :  { %3240 = vmatprep.subr.bf16.mxu0 %v4224_v47  ;;  %3412 = vmatprep.subr.bf16.mxu1 %v4226_v48  ;;  %v274_v47 = vld [vmem:[#allocation4 + $0x560] sm:$0xff]  ;;  %v271_v48 = vld [vmem:[#allocation4 + $0x548] sm:$0xff] }
  0x6c   :  { %v4288_v52 = vcombine.high %v270_v46, %v274_v47  ;;  %v4287_v61 = vcombine.low %v270_v46, %v274_v47  ;;  %v4289_v62 = vcombine.low %v271_v48, %v275_v49  ;;  %v331_v46 = vld [vmem:[#allocation4 + $0x728] sm:$0xff] }
  0x6e   :  { %3241 = vmatpush1.bf16.msra.mxu0 %v4223_v55  ;;  %3413 = vmatpush1.bf16.msra.mxu1 %v4225_v56  ;;  %v4290_v55 = vcombine.high %v271_v48, %v275_v49  ;;  %v278_v56 = vld [vmem:[#allocation4 + $0x580] sm:$0xff] }
  0x6f   :  { %3242 = vmatprep.subr.bf16.mxu0 %v4232_v57  ;;  %3414 = vmatprep.subr.bf16.mxu1 %v4234_v59  ;;  %v282_v57 = vld [vmem:[#allocation4 + $0x5a0] sm:$0xff]  ;;  %v279_v59 = vld [vmem:[#allocation4 + $0x588] sm:$0xff] }
  0x70   :  { %v4296_v63 = vcombine.high %v278_v56, %v282_v57  ;;  %v4295_v5 = vcombine.low %v278_v56, %v282_v57  ;;  %v4297_v6 = vcombine.low %v279_v59, %v283_v60  ;;  %v339_v56 = vld [vmem:[#allocation4 + $0x768] sm:$0xff] }
  0x72   :  { %3243 = vmatpush1.bf16.msra.mxu0 %v4231_v0  ;;  %3415 = vmatpush1.bf16.msra.mxu1 %v4233_v1  ;;  %v4298_v0 = vcombine.high %v279_v59, %v283_v60  ;;  %v286_v1 = vld [vmem:[#allocation4 + $0x5c0] sm:$0xff] }
  0x73   :  { %3244 = vmatprep.subr.bf16.mxu0 %v4240_v2  ;;  %3416 = vmatprep.subr.bf16.mxu1 %v4242_v3  ;;  %v290_v2 = vld [vmem:[#allocation4 + $0x5e0] sm:$0xff]  ;;  %v287_v3 = vld [vmem:[#allocation4 + $0x5c8] sm:$0xff] }
  0x74   :  { %v4304_v7 = vcombine.high %v286_v1, %v290_v2  ;;  %v4303_v13 = vcombine.low %v286_v1, %v290_v2  ;;  %v4305_v14 = vcombine.low %v287_v3, %v291_v4  ;;  %v347_v1 = vld [vmem:[#allocation4 + $0x7a8] sm:$0xff] }
  0x76   :  { %3245 = vmatpush1.bf16.msra.mxu0 %v4239_v8  ;;  %3417 = vmatpush1.bf16.msra.mxu1 %v4241_v9  ;;  %v4306_v8 = vcombine.high %v287_v3, %v291_v4  ;;  %v294_v9 = vld [vmem:[#allocation4 + $0x600] sm:$0xff] }
  0x77   :  { %3257 = vmatprep.subr.bf16.mxu0 %v4248_v10  ;;  %3429 = vmatprep.subr.bf16.mxu1 %v4250_v11  ;;  %v298_v10 = vld [vmem:[#allocation4 + $0x620] sm:$0xff]  ;;  %v295_v11 = vld [vmem:[#allocation4 + $0x608] sm:$0xff] }
  0x78   :  { %v4312_v16 = vcombine.high %v294_v9, %v298_v10  ;;  %v4311_v22 = vcombine.low %v294_v9, %v298_v10  ;;  %v4313_v24 = vcombine.low %v295_v11, %v299_v12  ;;  %v355_v9 = vld [vmem:[#allocation4 + $0x7e8] sm:$0xff] }
  0x79   :  { %3247 = vmatmul.mubr.bf16.vlgmr.msra.gmra.mrb[0].mxu0 %v4860_v15  ;;  %3419 = vmatmul.mubr.bf16.vlgmr.msra.gmra.mrb[0].mxu1 %v4860_v15 }
  0x7a   :  { %3258 = vmatpush1.bf16.msra.mxu0 %v4247_v19  ;;  %3430 = vmatpush1.bf16.msra.mxu1 %v4249_v20  ;;  %v4314_v19 = vcombine.high %v295_v11, %v299_v12  ;;  %v302_v20 = vld [vmem:[#allocation4 + $0x640] sm:$0xff] }
  0x7b   :  { %3259 = vmatprep.subr.bf16.mxu0 %v4256_v21  ;;  %3431 = vmatprep.subr.bf16.mxu1 %v4258_v53  ;;  %v306_v21 = vld [vmem:[#allocation4 + $0x660] sm:$0xff]  ;;  %v303_v53 = vld [vmem:[#allocation4 + $0x648] sm:$0xff] }
  0x7c   :  { %3289 = vmatprep.mubr.bf16.mxu0 %v4874_v23  ;;  %3461 = vmatprep.mubr.bf16.mxu1 %v4874_v23  ;;  %v4320_v25 = vcombine.high %v302_v20, %v306_v21  ;;  %v4319_v31 = vcombine.low %v302_v20, %v306_v21  ;;  %v4321_v32 = vcombine.low %v303_v53, %v307_v54  ;;  %v363_v20 = vld [vmem:[#allocation4 + $0x828] sm:$0xff] }
  0x7e   :  { %3260 = vmatpush1.bf16.msra.mxu0 %v4255_v26  ;;  %3432 = vmatpush1.bf16.msra.mxu1 %v4257_v27  ;;  %v4322_v26 = vcombine.high %v303_v53, %v307_v54  ;;  %v310_v27 = vld [vmem:[#allocation4 + $0x680] sm:$0xff] }
  0x7f   :  { %3261 = vmatprep.subr.bf16.mxu0 %v4264_v28  ;;  %3433 = vmatprep.subr.bf16.mxu1 %v4266_v29  ;;  %v314_v28 = vld [vmem:[#allocation4 + $0x6a0] sm:$0xff]  ;;  %v311_v29 = vld [vmem:[#allocation4 + $0x688] sm:$0xff] }
  0x80   :  { %v4328_v33 = vcombine.high %v310_v27, %v314_v28  ;;  %v4327_v39 = vcombine.low %v310_v27, %v314_v28  ;;  %v4329_v40 = vcombine.low %v311_v29, %v315_v30  ;;  %v4882_v27 = vcombine.low %v4865_v17, %v4870_v18  ;;  %v371_v28 = vld [vmem:[#allocation4 + $0x868] sm:$0xff]  ;;  %v374_v18 = vld [vmem:[#allocation4 + $0x880] sm:$0xff] }
  0x82   :  { %3262 = vmatpush1.bf16.msra.mxu0 %v4263_v34  ;;  %3434 = vmatpush1.bf16.msra.mxu1 %v4265_v35  ;;  %v4330_v34 = vcombine.high %v311_v29, %v315_v30  ;;  %v318_v35 = vld [vmem:[#allocation4 + $0x6c0] sm:$0xff]  ;;  %v4887_v29 = vld [vmem:[%s4995_s0 + $0x10] sm:$0xff] }
  0x83   :  { %3263 = vmatprep.subr.bf16.mxu0 %v4272_v36  ;;  %3435 = vmatprep.subr.bf16.mxu1 %v4274_v37  ;;  %v322_v36 = vld [vmem:[#allocation4 + $0x6e0] sm:$0xff]  ;;  %v319_v37 = vld [vmem:[#allocation4 + $0x6c8] sm:$0xff]  ;;  %v4892_v30 = vld [vmem:[%s4995_s0 + $0x30] sm:$0xff] }
  0x84   :  { %v4336_v41 = vcombine.high %v318_v35, %v322_v36  ;;  %v4335_v47 = vcombine.low %v318_v35, %v322_v36  ;;  %v4337_v48 = vcombine.low %v319_v37, %v323_v38  ;;  %v4896_v35 = vcombine.high %v4887_v29, %v4892_v30  ;;  %v375_v36 = vld [vmem:[#allocation4 + $0x888] sm:$0xff] }
  0x86   :  { %3264 = vmatpush1.bf16.msra.mxu0 %v4271_v42  ;;  %3436 = vmatpush1.bf16.msra.mxu1 %v4273_v43  ;;  %v4338_v42 = vcombine.high %v319_v37, %v323_v38  ;;  %v326_v43 = vld [vmem:[#allocation4 + $0x700] sm:$0xff]  ;;  %v379_v37 = vld [vmem:[#allocation4 + $0x8a8] sm:$0xff] }
  0x87   :  { %3265 = vmatprep.subr.bf16.mxu0 %v4280_v44  ;;  %3437 = vmatprep.subr.bf16.mxu1 %v4282_v45  ;;  %v330_v44 = vld [vmem:[#allocation4 + $0x720] sm:$0xff]  ;;  %v327_v45 = vld [vmem:[#allocation4 + $0x708] sm:$0xff] }
  0x88   :  { %v4344_v49 = vcombine.high %v326_v43, %v330_v44  ;;  %v4343_v57 = vcombine.low %v326_v43, %v330_v44  ;;  %v4345_v59 = vcombine.low %v327_v45, %v331_v46  ;;  %v386_v43 = vld [vmem:[#allocation4 + $0x8e0] sm:$0xff]  ;;  %v383_v44 = vld [vmem:[#allocation4 + $0x8c8] sm:$0xff] }
  0x8a   :  { %3266 = vmatpush1.bf16.msra.mxu0 %v4279_v50  ;;  %3438 = vmatpush1.bf16.msra.mxu1 %v4281_v51  ;;  %v4346_v50 = vcombine.high %v327_v45, %v331_v46  ;;  %v334_v51 = vld [vmem:[#allocation4 + $0x740] sm:$0xff]  ;;  %v387_v45 = vld [vmem:[#allocation4 + $0x8e8] sm:$0xff] }
  0x8b   :  { %3267 = vmatprep.subr.bf16.mxu0 %v4288_v52  ;;  %3439 = vmatprep.subr.bf16.mxu1 %v4290_v55  ;;  %v338_v52 = vld [vmem:[#allocation4 + $0x760] sm:$0xff]  ;;  %v335_v55 = vld [vmem:[#allocation4 + $0x748] sm:$0xff] }
  0x8c   :  { %v4352_v60 = vcombine.high %v334_v51, %v338_v52  ;;  %v4351_v2 = vcombine.low %v334_v51, %v338_v52  ;;  %v4353_v3 = vcombine.low %v335_v55, %v339_v56  ;;  %v394_v51 = vld [vmem:[#allocation4 + $0x920] sm:$0xff]  ;;  %v391_v52 = vld [vmem:[#allocation4 + $0x908] sm:$0xff] }
  0x8e   :  { %3268 = vmatpush1.bf16.msra.mxu0 %v4287_v61  ;;  %3440 = vmatpush1.bf16.msra.mxu1 %v4289_v62  ;;  %v4354_v61 = vcombine.high %v335_v55, %v339_v56  ;;  %v342_v62 = vld [vmem:[#allocation4 + $0x780] sm:$0xff]  ;;  %v395_v55 = vld [vmem:[#allocation4 + $0x928] sm:$0xff] }
  0x8f   :  { %3269 = vmatprep.subr.bf16.mxu0 %v4296_v63  ;;  %3441 = vmatprep.subr.bf16.mxu1 %v4298_v0  ;;  %v346_v63 = vld [vmem:[#allocation4 + $0x7a0] sm:$0xff]  ;;  %v343_v0 = vld [vmem:[#allocation4 + $0x788] sm:$0xff] }
  0x90   :  { %v4360_v4 = vcombine.high %v342_v62, %v346_v63  ;;  %v4359_v10 = vcombine.low %v342_v62, %v346_v63  ;;  %v4361_v11 = vcombine.low %v343_v0, %v347_v1  ;;  %v402_v62 = vld [vmem:[#allocation4 + $0x960] sm:$0xff]  ;;  %v399_v63 = vld [vmem:[#allocation4 + $0x948] sm:$0xff] }
  0x92   :  { %3270 = vmatpush1.bf16.msra.mxu0 %v4295_v5  ;;  %3442 = vmatpush1.bf16.msra.mxu1 %v4297_v6  ;;  %v4362_v5 = vcombine.high %v343_v0, %v347_v1  ;;  %v350_v6 = vld [vmem:[#allocation4 + $0x7c0] sm:$0xff]  ;;  %v403_v0 = vld [vmem:[#allocation4 + $0x968] sm:$0xff] }
  0x93   :  { %3271 = vmatprep.subr.bf16.mxu0 %v4304_v7  ;;  %3443 = vmatprep.subr.bf16.mxu1 %v4306_v8  ;;  %v354_v7 = vld [vmem:[#allocation4 + $0x7e0] sm:$0xff]  ;;  %v351_v8 = vld [vmem:[#allocation4 + $0x7c8] sm:$0xff] }
  0x94   :  { %v4368_v12 = vcombine.high %v350_v6, %v354_v7  ;;  %v4367_v21 = vcombine.low %v350_v6, %v354_v7  ;;  %v4369_v53 = vcombine.low %v351_v8, %v355_v9  ;;  %v410_v6 = vld [vmem:[#allocation4 + $0x9a0] sm:$0xff]  ;;  %v407_v7 = vld [vmem:[#allocation4 + $0x988] sm:$0xff] }
  0x96   :  { %3272 = vmatpush1.bf16.msra.mxu0 %v4303_v13  ;;  %3444 = vmatpush1.bf16.msra.mxu1 %v4305_v14  ;;  %v4370_v13 = vcombine.high %v351_v8, %v355_v9  ;;  %v358_v14 = vld [vmem:[#allocation4 + $0x800] sm:$0xff]  ;;  %v411_v8 = vld [vmem:[#allocation4 + $0x9a8] sm:$0xff] }
  0x97   :  { %3273 = vmatprep.subr.bf16.mxu0 %v4312_v16  ;;  %3445 = vmatprep.subr.bf16.mxu1 %v4314_v19  ;;  %v362_v16 = vld [vmem:[#allocation4 + $0x820] sm:$0xff]  ;;  %v359_v19 = vld [vmem:[#allocation4 + $0x808] sm:$0xff] }
  0x98   :  { %v4376_v54 = vcombine.high %v358_v14, %v362_v16 }
  0x9a   :  { %3274 = vmatpush1.bf16.msra.mxu0 %v4311_v22  ;;  %3446 = vmatpush1.bf16.msra.mxu1 %v4313_v24  ;;  %v4378_v22 = vcombine.high %v359_v19, %v363_v20  ;;  %v366_v24 = vld [vmem:[#allocation4 + $0x840] sm:$0xff] }
  0x9b   :  { %3275 = vmatprep.subr.bf16.mxu0 %v4320_v25  ;;  %3447 = vmatprep.subr.bf16.mxu1 %v4322_v26  ;;  %v370_v25 = vld [vmem:[#allocation4 + $0x860] sm:$0xff]  ;;  %v367_v26 = vld [vmem:[#allocation4 + $0x848] sm:$0xff] }
  0x9c   :  { %v4386_v17 = vcombine.high %v367_v26, %v371_v28  ;;  %v4383_v38 = vcombine.low %v366_v24, %v370_v25 }
  0x9e   :  { %3276 = vmatpush1.bf16.msra.mxu0 %v4319_v31  ;;  %3448 = vmatpush1.bf16.msra.mxu1 %v4321_v32  ;;  %v4375_v31 = vcombine.low %v358_v14, %v362_v16  ;;  %v4377_v32 = vcombine.low %v359_v19, %v363_v20  ;;  %v418_v14 = vld [vmem:[#allocation4 + $0x9e0] sm:$0xff]  ;;  %v415_v16 = vld [vmem:[#allocation4 + $0x9c8] sm:$0xff] }
  0x9f   :  { %3277 = vmatprep.subr.bf16.mxu0 %v4328_v33  ;;  %3449 = vmatprep.subr.bf16.mxu1 %v4330_v34  ;;  %v4384_v33 = vcombine.high %v366_v24, %v370_v25  ;;  %v378_v34 = vld [vmem:[#allocation4 + $0x8a0] sm:$0xff]  ;;  %v419_v19 = vld [vmem:[#allocation4 + $0x9e8] sm:$0xff] }
  0xa0   :  { %v4391_v46 = vcombine.low %v374_v18, %v378_v34  ;;  %v426_v24 = vld [vmem:[#allocation4 + $0xa20] sm:$0xff]  ;;  %v423_v25 = vld [vmem:[#allocation4 + $0xa08] sm:$0xff] }
  0xa2   :  { %3278 = vmatpush1.bf16.msra.mxu0 %v4327_v39  ;;  %3450 = vmatpush1.bf16.msra.mxu1 %v4329_v40  ;;  %v4385_v39 = vcombine.low %v367_v26, %v371_v28  ;;  %v4392_v40 = vcombine.high %v374_v18, %v378_v34  ;;  %v427_v26 = vld [vmem:[#allocation4 + $0xa28] sm:$0xff]  ;;  %v434_v18 = vld [vmem:[#allocation4 + $0xa60] sm:$0xff] }
  0xa3   :  { %3279 = vmatprep.subr.bf16.mxu0 %v4336_v41  ;;  %3451 = vmatprep.subr.bf16.mxu1 %v4338_v42  ;;  %v4394_v41 = vcombine.high %v375_v36, %v379_v37  ;;  %v382_v42 = vld [vmem:[#allocation4 + $0x8c0] sm:$0xff]  ;;  %v431_v34 = vld [vmem:[#allocation4 + $0xa48] sm:$0xff] }
  0xa4   :  { %v4399_v56 = vcombine.low %v382_v42, %v386_v43 }
  0xa6   :  { %3280 = vmatpush1.bf16.msra.mxu0 %v4335_v47  ;;  %3452 = vmatpush1.bf16.msra.mxu1 %v4337_v48  ;;  %v4393_v47 = vcombine.low %v375_v36, %v379_v37  ;;  %v4400_v48 = vcombine.high %v382_v42, %v386_v43  ;;  %v435_v36 = vld [vmem:[#allocation4 + $0xa68] sm:$0xff]  ;;  %v442_v42 = vld [vmem:[#allocation4 + $0xaa0] sm:$0xff] }
  0xa7   :  { %3281 = vmatprep.subr.bf16.mxu0 %v4344_v49  ;;  %3453 = vmatprep.subr.bf16.mxu1 %v4346_v50  ;;  %v4402_v49 = vcombine.high %v383_v44, %v387_v45  ;;  %v390_v50 = vld [vmem:[#allocation4 + $0x900] sm:$0xff]  ;;  %v439_v43 = vld [vmem:[#allocation4 + $0xa88] sm:$0xff] }
  0xa8   :  { %v4407_v1 = vcombine.low %v390_v50, %v394_v51 }
  0xaa   :  { %3282 = vmatpush1.bf16.msra.mxu0 %v4343_v57  ;;  %3454 = vmatpush1.bf16.msra.mxu1 %v4345_v59  ;;  %v4401_v57 = vcombine.low %v383_v44, %v387_v45  ;;  %v4408_v59 = vcombine.high %v390_v50, %v394_v51  ;;  %v443_v44 = vld [vmem:[#allocation4 + $0xaa8] sm:$0xff]  ;;  %v450_v50 = vld [vmem:[#allocation4 + $0xae0] sm:$0xff] }
  0xab   :  { %3283 = vmatprep.subr.bf16.mxu0 %v4352_v60  ;;  %3455 = vmatprep.subr.bf16.mxu1 %v4354_v61  ;;  %v4410_v60 = vcombine.high %v391_v52, %v395_v55  ;;  %v398_v61 = vld [vmem:[#allocation4 + $0x940] sm:$0xff]  ;;  %v447_v51 = vld [vmem:[#allocation4 + $0xac8] sm:$0xff] }
  0xac   :  { %v4415_v9 = vcombine.low %v398_v61, %v402_v62 }
  0xae   :  { %3284 = vmatpush1.bf16.msra.mxu0 %v4351_v2  ;;  %3456 = vmatpush1.bf16.msra.mxu1 %v4353_v3  ;;  %v4409_v2 = vcombine.low %v391_v52, %v395_v55  ;;  %v4416_v3 = vcombine.high %v398_v61, %v402_v62  ;;  %v451_v52 = vld [vmem:[#allocation4 + $0xae8] sm:$0xff]  ;;  %v458_v61 = vld [vmem:[#allocation4 + $0xb20] sm:$0xff] }
  0xaf   :  { %3285 = vmatprep.subr.bf16.mxu0 %v4360_v4  ;;  %3457 = vmatprep.subr.bf16.mxu1 %v4362_v5  ;;  %v4418_v4 = vcombine.high %v399_v63, %v403_v0  ;;  %v406_v5 = vld [vmem:[#allocation4 + $0x980] sm:$0xff]  ;;  %v455_v62 = vld [vmem:[#allocation4 + $0xb08] sm:$0xff] }
  0xb0   :  { %v4423_v20 = vcombine.low %v406_v5, %v410_v6 }
  0xb2   :  { %3286 = vmatpush1.bf16.msra.mxu0 %v4359_v10  ;;  %3458 = vmatpush1.bf16.msra.mxu1 %v4361_v11  ;;  %v4417_v10 = vcombine.low %v399_v63, %v403_v0  ;;  %v4424_v11 = vcombine.high %v406_v5, %v410_v6  ;;  %v459_v63 = vld [vmem:[#allocation4 + $0xb28] sm:$0xff]  ;;  %v466_v5 = vld [vmem:[#allocation4 + $0xb60] sm:$0xff] }
  0xb3   :  { %3287 = vmatprep.subr.bf16.mxu0 %v4368_v12  ;;  %3459 = vmatprep.subr.bf16.mxu1 %v4370_v13  ;;  %v4426_v12 = vcombine.high %v407_v7, %v411_v8  ;;  %v414_v13 = vld [vmem:[#allocation4 + $0x9c0] sm:$0xff]  ;;  %v463_v6 = vld [vmem:[#allocation4 + $0xb48] sm:$0xff] }
  0xb4   :  { %v4431_v28 = vcombine.low %v414_v13, %v418_v14 }
  0xb6   :  { %3288 = vmatpush1.bf16.msra.mxu0 %v4367_v21  ;;  %3460 = vmatpush1.bf16.msra.mxu1 %v4369_v53  ;;  %v4425_v21 = vcombine.low %v407_v7, %v411_v8  ;;  %v4432_v53 = vcombine.high %v414_v13, %v418_v14  ;;  %v467_v7 = vld [vmem:[#allocation4 + $0xb68] sm:$0xff]  ;;  %v474_v13 = vld [vmem:[#allocation4 + $0xba0] sm:$0xff] }
  0xb7   :  { %3300 = vmatprep.subr.bf16.mxu0 %v4376_v54  ;;  %3472 = vmatprep.subr.bf16.mxu1 %v4378_v22  ;;  %v4434_v54 = vcombine.high %v415_v16, %v419_v19  ;;  %v422_v22 = vld [vmem:[#allocation4 + $0xa00] sm:$0xff]  ;;  %v471_v14 = vld [vmem:[#allocation4 + $0xb88] sm:$0xff] }
  0xb8   :  { %v4439_v37 = vcombine.low %v422_v22, %v426_v24 }
  0xb9   :  { %3290 = vmatmul.mubr.bf16.vlgmr.msra.gmra.mrb[0].mxu0 %v4882_v27  ;;  %3462 = vmatmul.mubr.bf16.vlgmr.msra.gmra.mrb[0].mxu1 %v4882_v27 }
  0xba   :  { %3301 = vmatpush1.bf16.msra.mxu0 %v4375_v31  ;;  %3473 = vmatpush1.bf16.msra.mxu1 %v4377_v32  ;;  %v4433_v31 = vcombine.low %v415_v16, %v419_v19  ;;  %v4440_v32 = vcombine.high %v422_v22, %v426_v24  ;;  %v475_v16 = vld [vmem:[#allocation4 + $0xba8] sm:$0xff]  ;;  %v482_v22 = vld [vmem:[#allocation4 + $0xbe0] sm:$0xff] }
  0xbb   :  { %3302 = vmatprep.subr.bf16.mxu0 %v4384_v33  ;;  %3474 = vmatprep.subr.bf16.mxu1 %v4386_v17  ;;  %v4442_v33 = vcombine.high %v423_v25, %v427_v26  ;;  %v430_v17 = vld [vmem:[#allocation4 + $0xa40] sm:$0xff]  ;;  %v479_v24 = vld [vmem:[#allocation4 + $0xbc8] sm:$0xff] }
  0xbc   :  { %3332 = vmatprep.mubr.bf16.mxu0 %v4896_v35  ;;  %3504 = vmatprep.mubr.bf16.mxu1 %v4896_v35  ;;  %v4447_v45 = vcombine.low %v430_v17, %v434_v18 }
  0xbe   :  { %3303 = vmatpush1.bf16.msra.mxu0 %v4383_v38  ;;  %3475 = vmatpush1.bf16.msra.mxu1 %v4385_v39  ;;  %v4441_v38 = vcombine.low %v423_v25, %v427_v26  ;;  %v4448_v39 = vcombine.high %v430_v17, %v434_v18  ;;  %v483_v25 = vld [vmem:[#allocation4 + $0xbe8] sm:$0xff]  ;;  %v490_v17 = vld [vmem:[#allocation4 + $0xc20] sm:$0xff] }
  0xbf   :  { %3304 = vmatprep.subr.bf16.mxu0 %v4392_v40  ;;  %3476 = vmatprep.subr.bf16.mxu1 %v4394_v41  ;;  %v4450_v40 = vcombine.high %v431_v34, %v435_v36  ;;  %v438_v41 = vld [vmem:[#allocation4 + $0xa80] sm:$0xff]  ;;  %v487_v18 = vld [vmem:[#allocation4 + $0xc08] sm:$0xff] }
  0xc0   :  { %v4455_v55 = vcombine.low %v438_v41, %v442_v42 }
  0xc2   :  { %3305 = vmatpush1.bf16.msra.mxu0 %v4391_v46  ;;  %3477 = vmatpush1.bf16.msra.mxu1 %v4393_v47  ;;  %v4449_v46 = vcombine.low %v431_v34, %v435_v36  ;;  %v4456_v47 = vcombine.high %v438_v41, %v442_v42  ;;  %v491_v34 = vld [vmem:[#allocation4 + $0xc28] sm:$0xff]  ;;  %v498_v41 = vld [vmem:[#allocation4 + $0xc60] sm:$0xff] }
  0xc3   :  { %3306 = vmatprep.subr.bf16.mxu0 %v4400_v48  ;;  %3478 = vmatprep.subr.bf16.mxu1 %v4402_v49  ;;  %v4458_v48 = vcombine.high %v439_v43, %v443_v44  ;;  %v446_v49 = vld [vmem:[#allocation4 + $0xac0] sm:$0xff]  ;;  %v495_v42 = vld [vmem:[#allocation4 + $0xc48] sm:$0xff] }
  0xc4   :  { %v4463_v0 = vcombine.low %v446_v49, %v450_v50 }
  0xc6   :  { %3307 = vmatpush1.bf16.msra.mxu0 %v4399_v56  ;;  %3479 = vmatpush1.bf16.msra.mxu1 %v4401_v57  ;;  %v4457_v56 = vcombine.low %v439_v43, %v443_v44  ;;  %v4464_v57 = vcombine.high %v446_v49, %v450_v50  ;;  %v4904_v43 = vcombine.low %v4887_v29, %v4892_v30  ;;  %v499_v44 = vld [vmem:[#allocation4 + $0xc68] sm:$0xff]  ;;  %v502_v30 = vld [vmem:[#allocation4 + $0xc80] sm:$0xff] }
  0xc7   :  { %3308 = vmatprep.subr.bf16.mxu0 %v4408_v59  ;;  %3480 = vmatprep.subr.bf16.mxu1 %v4410_v60  ;;  %v4466_v59 = vcombine.high %v447_v51, %v451_v52  ;;  %v454_v60 = vld [vmem:[#allocation4 + $0xb00] sm:$0xff]  ;;  %v4514_v29 = vcombine.high %v495_v42, %v499_v44 }
  0xc8   :  { %v4471_v8 = vcombine.low %v454_v60, %v458_v61  ;;  %v506_v50 = vld [vmem:[#allocation4 + $0xca0] sm:$0xff] }
  0xca   :  { %3309 = vmatpush1.bf16.msra.mxu0 %v4407_v1  ;;  %3481 = vmatpush1.bf16.msra.mxu1 %v4409_v2  ;;  %v4465_v1 = vcombine.low %v447_v51, %v451_v52  ;;  %v4472_v2 = vcombine.high %v454_v60, %v458_v61  ;;  %v503_v52 = vld [vmem:[#allocation4 + $0xc88] sm:$0xff]  ;;  %v510_v61 = vld [vmem:[#allocation4 + $0xcc0] sm:$0xff] }
  0xcb   :  { %3310 = vmatprep.subr.bf16.mxu0 %v4416_v3  ;;  %3482 = vmatprep.subr.bf16.mxu1 %v4418_v4  ;;  %v4474_v3 = vcombine.high %v455_v62, %v459_v63  ;;  %v462_v4 = vld [vmem:[#allocation4 + $0xb40] sm:$0xff] }
  0xcc   :  { %v4479_v19 = vcombine.low %v462_v4, %v466_v5 }
  0xce   :  { %3311 = vmatpush1.bf16.msra.mxu0 %v4415_v9  ;;  %3483 = vmatpush1.bf16.msra.mxu1 %v4417_v10  ;;  %v4473_v9 = vcombine.low %v455_v62, %v459_v63  ;;  %v4480_v10 = vcombine.high %v462_v4, %v466_v5  ;;  %v514_v62 = vld [vmem:[#allocation4 + $0xce0] sm:$0xff]  ;;  %v511_v63 = vld [vmem:[#allocation4 + $0xcc8] sm:$0xff] }
  0xcf   :  { %3312 = vmatprep.subr.bf16.mxu0 %v4424_v11  ;;  %3484 = vmatprep.subr.bf16.mxu1 %v4426_v12  ;;  %v4482_v11 = vcombine.high %v463_v6, %v467_v7  ;;  %v470_v12 = vld [vmem:[#allocation4 + $0xb80] sm:$0xff] }
  0xd0   :  { %v4487_v26 = vcombine.low %v470_v12, %v474_v13  ;;  %v518_v5 = vld [vmem:[#allocation4 + $0xd00] sm:$0xff] }
  0xd2   :  { %3313 = vmatpush1.bf16.msra.mxu0 %v4423_v20  ;;  %3485 = vmatpush1.bf16.msra.mxu1 %v4425_v21  ;;  %v4481_v20 = vcombine.low %v463_v6, %v467_v7  ;;  %v4488_v21 = vcombine.high %v470_v12, %v474_v13  ;;  %v522_v6 = vld [vmem:[#allocation4 + $0xd20] sm:$0xff]  ;;  %v519_v7 = vld [vmem:[#allocation4 + $0xd08] sm:$0xff] }
  0xd3   :  { %3314 = vmatprep.subr.bf16.mxu0 %v4432_v53  ;;  %3486 = vmatprep.subr.bf16.mxu1 %v4434_v54  ;;  %v4490_v53 = vcombine.high %v471_v14, %v475_v16  ;;  %v478_v54 = vld [vmem:[#allocation4 + $0xbc0] sm:$0xff] }
  0xd4   :  { %v4495_v36 = vcombine.low %v478_v54, %v482_v22  ;;  %v526_v13 = vld [vmem:[#allocation4 + $0xd40] sm:$0xff] }
  0xd6   :  { %3315 = vmatpush1.bf16.msra.mxu0 %v4431_v28  ;;  %3487 = vmatpush1.bf16.msra.mxu1 %v4433_v31  ;;  %v4489_v28 = vcombine.low %v471_v14, %v475_v16  ;;  %v4496_v31 = vcombine.high %v478_v54, %v482_v22  ;;  %v530_v14 = vld [vmem:[#allocation4 + $0xd60] sm:$0xff]  ;;  %v527_v16 = vld [vmem:[#allocation4 + $0xd48] sm:$0xff] }
  0xd7   :  { %3316 = vmatprep.subr.bf16.mxu0 %v4440_v32  ;;  %3488 = vmatprep.subr.bf16.mxu1 %v4442_v33  ;;  %v4498_v32 = vcombine.high %v479_v24, %v483_v25  ;;  %v486_v33 = vld [vmem:[#allocation4 + $0xc00] sm:$0xff] }
  0xd8   :  { %v534_v22 = vld [vmem:[#allocation4 + $0xd80] sm:$0xff] }
  0xda   :  { %3317 = vmatpush1.bf16.msra.mxu0 %v4439_v37  ;;  %3489 = vmatpush1.bf16.msra.mxu1 %v4441_v38  ;;  %v4497_v37 = vcombine.low %v479_v24, %v483_v25  ;;  %v4504_v38 = vcombine.high %v486_v33, %v490_v17  ;;  %v538_v24 = vld [vmem:[#allocation4 + $0xda0] sm:$0xff]  ;;  %v535_v25 = vld [vmem:[#allocation4 + $0xd88] sm:$0xff] }
  0xdb   :  { %3318 = vmatprep.subr.bf16.mxu0 %v4448_v39  ;;  %3490 = vmatprep.subr.bf16.mxu1 %v4450_v40  ;;  %v4506_v39 = vcombine.high %v487_v18, %v491_v34  ;;  %v494_v40 = vld [vmem:[#allocation4 + $0xc40] sm:$0xff] }
  0xdc   :  { %v4512_v49 = vcombine.high %v494_v40, %v498_v41 }
  0xde   :  { %3319 = vmatpush1.bf16.msra.mxu0 %v4447_v45  ;;  %3491 = vmatpush1.bf16.msra.mxu1 %v4449_v46  ;;  %v4909_v45 = vld [vmem:[%s4995_s0 + $0x18] sm:$0xff] }
  0xdf   :  { %3320 = vmatprep.subr.bf16.mxu0 %v4456_v47  ;;  %3492 = vmatprep.subr.bf16.mxu1 %v4458_v48  ;;  %v4914_v46 = vld [vmem:[%s4995_s0 + $0x38] sm:$0xff]  ;;  %v4503_v47 = vcombine.low %v486_v33, %v490_v17  ;;  %v4505_v48 = vcombine.low %v487_v18, %v491_v34  ;;  %v542_v17 = vld [vmem:[#allocation4 + $0xdc0] sm:$0xff]  ;;  %v543_v34 = vld [vmem:[#allocation4 + $0xdc8] sm:$0xff] }
  0xe0   :  { %v4918_v51 = vcombine.high %v4909_v45, %v4914_v46  ;;  %v546_v18 = vld [vmem:[#allocation4 + $0xde0] sm:$0xff] }
  0xe2   :  { %3321 = vmatpush1.bf16.msra.mxu0 %v4455_v55  ;;  %3493 = vmatpush1.bf16.msra.mxu1 %v4457_v56  ;;  %v507_v55 = vld [vmem:[#allocation4 + $0xca8] sm:$0xff]  ;;  %v4511_v56 = vcombine.low %v494_v40, %v498_v41  ;;  %v550_v41 = vld [vmem:[#allocation4 + $0xe00] sm:$0xff] }
  0xe3   :  { %3322 = vmatprep.subr.bf16.mxu0 %v4464_v57  ;;  %3494 = vmatprep.subr.bf16.mxu1 %v4466_v59  ;;  %v4513_v57 = vcombine.low %v495_v42, %v499_v44  ;;  %v4520_v59 = vcombine.high %v502_v30, %v506_v50  ;;  %v4522_v60 = vcombine.high %v503_v52, %v507_v55  ;;  %v554_v42 = vld [vmem:[#allocation4 + $0xe20] sm:$0xff]  ;;  %v551_v44 = vld [vmem:[#allocation4 + $0xe08] sm:$0xff] }
  0xe6   :  { %3323 = vmatpush1.bf16.msra.mxu0 %v4463_v0  ;;  %3495 = vmatpush1.bf16.msra.mxu1 %v4465_v1  ;;  %v515_v0 = vld [vmem:[#allocation4 + $0xce8] sm:$0xff]  ;;  %v4519_v1 = vcombine.low %v502_v30, %v506_v50  ;;  %v558_v50 = vld [vmem:[#allocation4 + $0xe40] sm:$0xff] }
  0xe7   :  { %3324 = vmatprep.subr.bf16.mxu0 %v4472_v2  ;;  %3496 = vmatprep.subr.bf16.mxu1 %v4474_v3  ;;  %v4521_v2 = vcombine.low %v503_v52, %v507_v55  ;;  %v4528_v3 = vcombine.high %v510_v61, %v514_v62  ;;  %v4530_v4 = vcombine.high %v511_v63, %v515_v0  ;;  %v562_v52 = vld [vmem:[#allocation4 + $0xe60] sm:$0xff]  ;;  %v559_v55 = vld [vmem:[#allocation4 + $0xe48] sm:$0xff] }
  0xea   :  { %3325 = vmatpush1.bf16.msra.mxu0 %v4471_v8  ;;  %3497 = vmatpush1.bf16.msra.mxu1 %v4473_v9  ;;  %v523_v8 = vld [vmem:[#allocation4 + $0xd28] sm:$0xff]  ;;  %v4527_v9 = vcombine.low %v510_v61, %v514_v62  ;;  %v566_v62 = vld [vmem:[#allocation4 + $0xe80] sm:$0xff] }
  0xeb   :  { %3326 = vmatprep.subr.bf16.mxu0 %v4480_v10  ;;  %3498 = vmatprep.subr.bf16.mxu1 %v4482_v11  ;;  %v4529_v10 = vcombine.low %v511_v63, %v515_v0  ;;  %v4536_v11 = vcombine.high %v518_v5, %v522_v6  ;;  %v4538_v12 = vcombine.high %v519_v7, %v523_v8  ;;  %v570_v63 = vld [vmem:[#allocation4 + $0xea0] sm:$0xff]  ;;  %v567_v0 = vld [vmem:[#allocation4 + $0xe88] sm:$0xff] }
  0xee   :  { %3327 = vmatpush1.bf16.msra.mxu0 %v4479_v19  ;;  %3499 = vmatpush1.bf16.msra.mxu1 %v4481_v20  ;;  %v531_v19 = vld [vmem:[#allocation4 + $0xd68] sm:$0xff]  ;;  %v4535_v20 = vcombine.low %v518_v5, %v522_v6  ;;  %v574_v6 = vld [vmem:[#allocation4 + $0xec0] sm:$0xff] }
  0xef   :  { %3328 = vmatprep.subr.bf16.mxu0 %v4488_v21  ;;  %3500 = vmatprep.subr.bf16.mxu1 %v4490_v53  ;;  %v4537_v21 = vcombine.low %v519_v7, %v523_v8  ;;  %v4544_v53 = vcombine.high %v526_v13, %v530_v14  ;;  %v4546_v54 = vcombine.high %v527_v16, %v531_v19  ;;  %v578_v7 = vld [vmem:[#allocation4 + $0xee0] sm:$0xff]  ;;  %v575_v8 = vld [vmem:[#allocation4 + $0xec8] sm:$0xff] }
  0xf2   :  { %3329 = vmatpush1.bf16.msra.mxu0 %v4487_v26  ;;  %3501 = vmatpush1.bf16.msra.mxu1 %v4489_v28  ;;  %v539_v26 = vld [vmem:[#allocation4 + $0xda8] sm:$0xff]  ;;  %v4543_v28 = vcombine.low %v526_v13, %v530_v14  ;;  %v582_v14 = vld [vmem:[#allocation4 + $0xf00] sm:$0xff] }
  0xf3   :  { %3330 = vmatprep.subr.bf16.mxu0 %v4496_v31  ;;  %3502 = vmatprep.subr.bf16.mxu1 %v4498_v32  ;;  %v4545_v31 = vcombine.low %v527_v16, %v531_v19  ;;  %v4552_v32 = vcombine.high %v534_v22, %v538_v24  ;;  %v4554_v33 = vcombine.high %v535_v25, %v539_v26  ;;  %v586_v16 = vld [vmem:[#allocation4 + $0xf20] sm:$0xff]  ;;  %v583_v19 = vld [vmem:[#allocation4 + $0xf08] sm:$0xff] }
  0xf6   :  { %3331 = vmatpush1.bf16.msra.mxu0 %v4495_v36  ;;  %3503 = vmatpush1.bf16.msra.mxu1 %v4497_v37  ;;  %v547_v36 = vld [vmem:[#allocation4 + $0xde8] sm:$0xff]  ;;  %v4551_v37 = vcombine.low %v534_v22, %v538_v24  ;;  %v590_v24 = vld [vmem:[#allocation4 + $0xf40] sm:$0xff] }
  0xf7   :  { %3343 = vmatprep.subr.bf16.mxu0 %v4504_v38  ;;  %3515 = vmatprep.subr.bf16.mxu1 %v4506_v39  ;;  %v4553_v38 = vcombine.low %v535_v25, %v539_v26  ;;  %v4560_v39 = vcombine.high %v542_v17, %v546_v18  ;;  %v4562_v40 = vcombine.high %v543_v34, %v547_v36  ;;  %v594_v25 = vld [vmem:[#allocation4 + $0xf60] sm:$0xff]  ;;  %v591_v26 = vld [vmem:[#allocation4 + $0xf48] sm:$0xff] }
  0xf9   :  { %3333 = vmatmul.mubr.bf16.vlgmr.msra.gmra.mrb[0].mxu0 %v4904_v43  ;;  %3505 = vmatmul.mubr.bf16.vlgmr.msra.gmra.mrb[0].mxu1 %v4904_v43 }
  0xfa   :  { %3344 = vmatpush1.bf16.msra.mxu0 %v4503_v47  ;;  %3516 = vmatpush1.bf16.msra.mxu1 %v4505_v48  ;;  %v555_v47 = vld [vmem:[#allocation4 + $0xe28] sm:$0xff]  ;;  %v4559_v48 = vcombine.low %v542_v17, %v546_v18  ;;  %v598_v18 = vld [vmem:[#allocation4 + $0xf80] sm:$0xff] }
  0xfb   :  { %3345 = vmatprep.subr.bf16.mxu0 %v4512_v49  ;;  %3517 = vmatprep.subr.bf16.mxu1 %v4514_v29  ;;  %v4561_v49 = vcombine.low %v543_v34, %v547_v36  ;;  %v4568_v29 = vcombine.high %v550_v41, %v554_v42  ;;  %v4570_v30 = vcombine.high %v551_v44, %v555_v47  ;;  %v602_v34 = vld [vmem:[#allocation4 + $0xfa0] sm:$0xff]  ;;  %v599_v36 = vld [vmem:[#allocation4 + $0xf88] sm:$0xff] }
  0xfc   :  { %3375 = vmatprep.mubr.bf16.mxu0 %v4918_v51  ;;  %3547 = vmatprep.mubr.bf16.mxu1 %v4918_v51 }
  0xfe   :  { %3346 = vmatpush1.bf16.msra.mxu0 %v4511_v56  ;;  %3518 = vmatpush1.bf16.msra.mxu1 %v4513_v57  ;;  %v563_v56 = vld [vmem:[#allocation4 + $0xe68] sm:$0xff]  ;;  %v4567_v57 = vcombine.low %v550_v41, %v554_v42  ;;  %v606_v42 = vld [vmem:[#allocation4 + $0xfc0] sm:$0xff] }
  0xff   :  { %3347 = vmatprep.subr.bf16.mxu0 %v4520_v59  ;;  %3519 = vmatprep.subr.bf16.mxu1 %v4522_v60  ;;  %v4569_v59 = vcombine.low %v551_v44, %v555_v47  ;;  %v4576_v60 = vcombine.high %v558_v50, %v562_v52  ;;  %v4578_v61 = vcombine.high %v559_v55, %v563_v56  ;;  %v610_v44 = vld [vmem:[#allocation4 + $0xfe0] sm:$0xff]  ;;  %v607_v47 = vld [vmem:[#allocation4 + $0xfc8] sm:$0xff] }
 0x102   :  { %3348 = vmatpush1.bf16.msra.mxu0 %v4519_v1  ;;  %3520 = vmatpush1.bf16.msra.mxu1 %v4521_v2  ;;  %v571_v1 = vld [vmem:[#allocation4 + $0xea8] sm:$0xff]  ;;  %v4575_v2 = vcombine.low %v558_v50, %v562_v52  ;;  %v104_v52 = vld [vmem:[#allocation4 + $0x10] sm:$0xff] }
 0x103   :  { %3349 = vmatprep.subr.bf16.mxu0 %v4528_v3  ;;  %3521 = vmatprep.subr.bf16.mxu1 %v4530_v4  ;;  %v4577_v3 = vcombine.low %v559_v55, %v563_v56  ;;  %v4584_v4 = vcombine.high %v566_v62, %v570_v63  ;;  %v4586_v5 = vcombine.high %v567_v0, %v571_v1  ;;  %v108_v55 = vld [vmem:[#allocation4 + $0x30] sm:$0xff]  ;;  %v105_v56 = vld [vmem:[#allocation4 + $0x18] sm:$0xff] }
 0x106   :  { %3350 = vmatpush1.bf16.msra.mxu0 %v4527_v9  ;;  %3522 = vmatpush1.bf16.msra.mxu1 %v4529_v10  ;;  %v579_v9 = vld [vmem:[#allocation4 + $0xee8] sm:$0xff]  ;;  %v4583_v10 = vcombine.low %v566_v62, %v570_v63  ;;  %v112_v63 = vld [vmem:[#allocation4 + $0x50] sm:$0xff] }
 0x107   :  { %3351 = vmatprep.subr.bf16.mxu0 %v4536_v11  ;;  %3523 = vmatprep.subr.bf16.mxu1 %v4538_v12  ;;  %v4585_v11 = vcombine.low %v567_v0, %v571_v1  ;;  %v4592_v12 = vcombine.high %v574_v6, %v578_v7  ;;  %v4594_v13 = vcombine.high %v575_v8, %v579_v9  ;;  %v116_v0 = vld [vmem:[#allocation4 + $0x70] sm:$0xff] }
 0x108   :  { %v4926_v1 = vcombine.low %v4909_v45, %v4914_v46  ;;  %v4131_v45 = vcombine.low %v112_v63, %v116_v0 }
 0x10a   :  { %3352 = vmatpush1.bf16.msra.mxu0 %v4535_v20  ;;  %3524 = vmatpush1.bf16.msra.mxu1 %v4537_v21  ;;  %v587_v20 = vld [vmem:[#allocation4 + $0xf28] sm:$0xff]  ;;  %v4591_v21 = vcombine.low %v574_v6, %v578_v7  ;;  %v4132_v6 = vcombine.high %v112_v63, %v116_v0  ;;  %v172_v63 = vld [vmem:[#allocation4 + $0x230] sm:$0xff]  ;;  %v169_v0 = vld [vmem:[#allocation4 + $0x218] sm:$0xff] }
 0x10b   :  { %3353 = vmatprep.subr.bf16.mxu0 %v4544_v53  ;;  %3525 = vmatprep.subr.bf16.mxu1 %v4546_v54  ;;  %v4593_v53 = vcombine.low %v575_v8, %v579_v9  ;;  %v4600_v54 = vcombine.high %v582_v14, %v586_v16  ;;  %v4602_v22 = vcombine.high %v583_v19, %v587_v20  ;;  %v120_v8 = vld [vmem:[#allocation4 + $0x90] sm:$0xff] }
 0x10c   :  { %v124_v9 = vld [vmem:[#allocation4 + $0xb0] sm:$0xff] }
 0x10e   :  { %3354 = vmatpush1.bf16.msra.mxu0 %v4543_v28  ;;  %3526 = vmatpush1.bf16.msra.mxu1 %v4545_v31  ;;  %v595_v28 = vld [vmem:[#allocation4 + $0xf68] sm:$0xff]  ;;  %v4599_v31 = vcombine.low %v582_v14, %v586_v16  ;;  %v128_v14 = vld [vmem:[#allocation4 + $0xd0] sm:$0xff] }
 0x10f   :  { %3355 = vmatprep.subr.bf16.mxu0 %v4552_v32  ;;  %3527 = vmatprep.subr.bf16.mxu1 %v4554_v33  ;;  %v4601_v32 = vcombine.low %v583_v19, %v587_v20  ;;  %v4608_v33 = vcombine.high %v590_v24, %v594_v25  ;;  %v4610_v17 = vcombine.high %v591_v26, %v595_v28  ;;  %v132_v16 = vld [vmem:[#allocation4 + $0xf0] sm:$0xff]  ;;  %v129_v19 = vld [vmem:[#allocation4 + $0xd8] sm:$0xff] }
 0x110   :  { %v133_v20 = vld [vmem:[#allocation4 + $0xf8] sm:$0xff] }
 0x112   :  { %3356 = vmatpush1.bf16.msra.mxu0 %v4551_v37  ;;  %3528 = vmatpush1.bf16.msra.mxu1 %v4553_v38  ;;  %v603_v37 = vld [vmem:[#allocation4 + $0xfa8] sm:$0xff]  ;;  %v4607_v38 = vcombine.low %v590_v24, %v594_v25  ;;  %v136_v24 = vld [vmem:[#allocation4 + $0x110] sm:$0xff] }
 0x113   :  { %3357 = vmatprep.subr.bf16.mxu0 %v4560_v39  ;;  %3529 = vmatprep.subr.bf16.mxu1 %v4562_v40  ;;  %v4609_v39 = vcombine.low %v591_v26, %v595_v28  ;;  %v4616_v40 = vcombine.high %v598_v18, %v602_v34  ;;  %v4618_v41 = vcombine.high %v599_v36, %v603_v37  ;;  %v140_v25 = vld [vmem:[#allocation4 + $0x130] sm:$0xff]  ;;  %v137_v26 = vld [vmem:[#allocation4 + $0x118] sm:$0xff] }
 0x114   :  { %v141_v28 = vld [vmem:[#allocation4 + $0x138] sm:$0xff] }
 0x116   :  { %3358 = vmatpush1.bf16.msra.mxu0 %v4559_v48  ;;  %3530 = vmatpush1.bf16.msra.mxu1 %v4561_v49  ;;  %v611_v48 = vld [vmem:[#allocation4 + $0xfe8] sm:$0xff]  ;;  %v4615_v49 = vcombine.low %v598_v18, %v602_v34  ;;  %v148_v18 = vld [vmem:[#allocation4 + $0x170] sm:$0xff]  ;;  %v145_v34 = vld [vmem:[#allocation4 + $0x158] sm:$0xff] }
 0x117   :  { %3359 = vmatprep.subr.bf16.mxu0 %v4568_v29  ;;  %3531 = vmatprep.subr.bf16.mxu1 %v4570_v30  ;;  %v4617_v29 = vcombine.low %v599_v36, %v603_v37  ;;  %v4624_v30 = vcombine.high %v606_v42, %v610_v44  ;;  %v4626_v50 = vcombine.high %v607_v47, %v611_v48  ;;  %v149_v36 = vld [vmem:[#allocation4 + $0x178] sm:$0xff] }
 0x118   :  { %v4155_v37 = vcombine.low %v136_v24, %v140_v25 }
 0x11a   :  { %3360 = vmatpush1.bf16.msra.mxu0 %v4567_v57  ;;  %3532 = vmatpush1.bf16.msra.mxu1 %v4569_v59  ;;  %v109_v57 = vld [vmem:[#allocation4 + $0x38] sm:$0xff]  ;;  %v4623_v59 = vcombine.low %v606_v42, %v610_v44  ;;  %v156_v42 = vld [vmem:[#allocation4 + $0x1b0] sm:$0xff] }
 0x11b   :  { %3361 = vmatprep.subr.bf16.mxu0 %v4576_v60  ;;  %3533 = vmatprep.subr.bf16.mxu1 %v4578_v61  ;;  %v4625_v60 = vcombine.low %v607_v47, %v611_v48  ;;  %v4124_v61 = vcombine.high %v104_v52, %v108_v55  ;;  %v4126_v62 = vcombine.high %v105_v56, %v109_v57  ;;  %v153_v44 = vld [vmem:[#allocation4 + $0x198] sm:$0xff] }
 0x11c   :  { %v157_v47 = vld [vmem:[#allocation4 + $0x1b8] sm:$0xff] }
 0x11e   :  { %3362 = vmatpush1.bf16.msra.mxu0 %v4575_v2  ;;  %3534 = vmatpush1.bf16.msra.mxu1 %v4577_v3  ;;  %v113_v2 = vld [vmem:[#allocation4 + $0x58] sm:$0xff] }
 0x11f   :  { %3363 = vmatprep.subr.bf16.mxu0 %v4584_v4  ;;  %3535 = vmatprep.subr.bf16.mxu1 %v4586_v5  ;;  %v117_v3 = vld [vmem:[#allocation4 + $0x78] sm:$0xff]  ;;  %v4123_v4 = vcombine.low %v104_v52, %v108_v55  ;;  %v4125_v5 = vcombine.low %v105_v56, %v109_v57  ;;  %v164_v52 = vld [vmem:[#allocation4 + $0x1f0] sm:$0xff] }
 0x120   :  { %v4134_v7 = vcombine.high %v113_v2, %v117_v3  ;;  %v4133_v46 = vcombine.low %v113_v2, %v117_v3  ;;  %v161_v55 = vld [vmem:[#allocation4 + $0x1d8] sm:$0xff] }
 0x121   :  { %v165_v56 = vld [vmem:[#allocation4 + $0x1f8] sm:$0xff] }
 0x122   :  { %3364 = vmatpush1.bf16.msra.mxu0 %v4583_v10  ;;  %3536 = vmatpush1.bf16.msra.mxu1 %v4585_v11  ;;  %v121_v10 = vld [vmem:[#allocation4 + $0x98] sm:$0xff] }
 0x123   :  { %3365 = vmatprep.subr.bf16.mxu0 %v4592_v12  ;;  %3537 = vmatprep.subr.bf16.mxu1 %v4594_v13  ;;  %v125_v11 = vld [vmem:[#allocation4 + $0xb8] sm:$0xff]  ;;  %v4140_v12 = vcombine.high %v120_v8, %v124_v9 }
 0x124   :  { %v4142_v13 = vcombine.high %v121_v10, %v125_v11  ;;  %v173_v2 = vld [vmem:[#allocation4 + $0x238] sm:$0xff] }
 0x126   :  { %3366 = vmatpush1.bf16.msra.mxu0 %v4591_v21  ;;  %3538 = vmatpush1.bf16.msra.mxu1 %v4593_v53  ;;  %v4139_v21 = vcombine.low %v120_v8, %v124_v9  ;;  %v4141_v53 = vcombine.low %v121_v10, %v125_v11  ;;  %v180_v8 = vld [vmem:[#allocation4 + $0x270] sm:$0xff]  ;;  %v177_v9 = vld [vmem:[#allocation4 + $0x258] sm:$0xff] }
 0x127   :  { %3367 = vmatprep.subr.bf16.mxu0 %v4600_v54  ;;  %3539 = vmatprep.subr.bf16.mxu1 %v4602_v22  ;;  %v4148_v54 = vcombine.high %v128_v14, %v132_v16  ;;  %v4150_v22 = vcombine.high %v129_v19, %v133_v20  ;;  %v181_v10 = vld [vmem:[#allocation4 + $0x278] sm:$0xff] }
 0x12a   :  { %3368 = vmatpush1.bf16.msra.mxu0 %v4599_v31  ;;  %3540 = vmatpush1.bf16.msra.mxu1 %v4601_v32  ;;  %v4147_v31 = vcombine.low %v128_v14, %v132_v16  ;;  %v4149_v32 = vcombine.low %v129_v19, %v133_v20  ;;  %v188_v14 = vld [vmem:[#allocation4 + $0x2b0] sm:$0xff]  ;;  %v185_v16 = vld [vmem:[#allocation4 + $0x298] sm:$0xff] }
 0x12b   :  { %3369 = vmatprep.subr.bf16.mxu0 %v4608_v33  ;;  %3541 = vmatprep.subr.bf16.mxu1 %v4610_v17  ;;  %v4156_v33 = vcombine.high %v136_v24, %v140_v25  ;;  %v144_v17 = vld [vmem:[#allocation4 + $0x150] sm:$0xff]  ;;  %v189_v19 = vld [vmem:[#allocation4 + $0x2b8] sm:$0xff] }
 0x12c   :  { %v4163_v48 = vcombine.low %v144_v17, %v148_v18  ;;  %v196_v24 = vld [vmem:[#allocation4 + $0x2f0] sm:$0xff]  ;;  %v193_v25 = vld [vmem:[#allocation4 + $0x2d8] sm:$0xff] }
 0x12e   :  { %3370 = vmatpush1.bf16.msra.mxu0 %v4607_v38  ;;  %3542 = vmatpush1.bf16.msra.mxu1 %v4609_v39  ;;  %v4157_v38 = vcombine.low %v137_v26, %v141_v28  ;;  %v4164_v39 = vcombine.high %v144_v17, %v148_v18  ;;  %v204_v17 = vld [vmem:[#allocation4 + $0x330] sm:$0xff]  ;;  %v201_v18 = vld [vmem:[#allocation4 + $0x318] sm:$0xff] }
 0x12f   :  { %3371 = vmatprep.subr.bf16.mxu0 %v4616_v40  ;;  %3543 = vmatprep.subr.bf16.mxu1 %v4618_v41  ;;  %v4166_v40 = vcombine.high %v145_v34, %v149_v36  ;;  %v152_v41 = vld [vmem:[#allocation4 + $0x190] sm:$0xff] }
 0x130   :  { %v4171_v57 = vcombine.low %v152_v41, %v156_v42 }
 0x132   :  { %3372 = vmatpush1.bf16.msra.mxu0 %v4615_v49  ;;  %3544 = vmatpush1.bf16.msra.mxu1 %v4617_v29  ;;  %v4165_v49 = vcombine.low %v145_v34, %v149_v36  ;;  %v4172_v29 = vcombine.high %v152_v41, %v156_v42  ;;  %v205_v34 = vld [vmem:[#allocation4 + $0x338] sm:$0xff]  ;;  %v212_v41 = vld [vmem:[#allocation4 + $0x370] sm:$0xff] }
 0x133   :  { %3373 = vmatprep.subr.bf16.mxu0 %v4624_v30  ;;  %3545 = vmatprep.subr.bf16.mxu1 %v4626_v50  ;;  %v4174_v30 = vcombine.high %v153_v44, %v157_v47  ;;  %v160_v50 = vld [vmem:[#allocation4 + $0x1d0] sm:$0xff]  ;;  %v209_v42 = vld [vmem:[#allocation4 + $0x358] sm:$0xff] }
 0x134   :  { %v4179_v3 = vcombine.low %v160_v50, %v164_v52 }
 0x136   :  { %3374 = vmatpush1.bf16.msra.mxu0 %v4623_v59  ;;  %3546 = vmatpush1.bf16.msra.mxu1 %v4625_v60  ;;  %v4173_v59 = vcombine.low %v153_v44, %v157_v47  ;;  %v4180_v60 = vcombine.high %v160_v50, %v164_v52  ;;  %v213_v44 = vld [vmem:[#allocation4 + $0x378] sm:$0xff]  ;;  %v220_v50 = vld [vmem:[#allocation4 + $0x3b0] sm:$0xff] }
 0x137   :  { %3558 = vmatprep.subr.bf16.mxu0 %v4124_v61  ;;  %3730 = vmatprep.subr.bf16.mxu1 %v4126_v62  ;;  %v4182_v61 = vcombine.high %v161_v55, %v165_v56  ;;  %v168_v62 = vld [vmem:[#allocation4 + $0x210] sm:$0xff]  ;;  %v217_v52 = vld [vmem:[#allocation4 + $0x398] sm:$0xff] }
 0x138   :  { %v4187_v11 = vcombine.low %v168_v62, %v172_v63 }
 0x139   :  { %3376 = vmatmul.mubr.bf16.vlgmr.msra.gmra.mrb[0].mxu0 %v4926_v1  ;;  %3548 = vmatmul.mubr.bf16.vlgmr.msra.gmra.mrb[0].mxu1 %v4926_v1 }
 0x13a   :  { %3559 = vmatpush1.bf16.msra.mxu0 %v4123_v4  ;;  %3731 = vmatpush1.bf16.msra.mxu1 %v4125_v5  ;;  %v4181_v4 = vcombine.low %v161_v55, %v165_v56  ;;  %v4188_v5 = vcombine.high %v168_v62, %v172_v63  ;;  %v221_v55 = vld [vmem:[#allocation4 + $0x3b8] sm:$0xff]  ;;  %v228_v62 = vld [vmem:[#allocation4 + $0x3f0] sm:$0xff] }
 0x13b   :  { %3560 = vmatprep.subr.bf16.mxu0 %v4132_v6  ;;  %3732 = vmatprep.subr.bf16.mxu1 %v4134_v7  ;;  %v4190_v6 = vcombine.high %v169_v0, %v173_v2  ;;  %v176_v7 = vld [vmem:[#allocation4 + $0x250] sm:$0xff]  ;;  %v225_v63 = vld [vmem:[#allocation4 + $0x3d8] sm:$0xff] }
 0x13c   :  { %3590 = vmatprep.mubr.bf16.mxu0 %v4854_v58  ;;  %3762 = vmatprep.mubr.bf16.mxu1 %v4854_v58  ;;  %v4158_v58 = vcombine.high %v137_v26, %v141_v28  ;;  %v4195_v20 = vcombine.low %v176_v7, %v180_v8  ;;  %v197_v26 = vld [vmem:[#allocation4 + $0x2f8] sm:$0xff] }
 0x13e   :  { %3561 = vmatpush1.bf16.msra.mxu0 %v4131_v45  ;;  %3733 = vmatpush1.bf16.msra.mxu1 %v4133_v46  ;;  %v4189_v45 = vcombine.low %v169_v0, %v173_v2  ;;  %v4196_v46 = vcombine.high %v176_v7, %v180_v8  ;;  %v229_v0 = vld [vmem:[#allocation4 + $0x3f8] sm:$0xff]  ;;  %v236_v7 = vld [vmem:[#allocation4 + $0x430] sm:$0xff] }
 0x13f   :  { %3562 = vmatprep.subr.bf16.mxu0 %v4140_v12  ;;  %3734 = vmatprep.subr.bf16.mxu1 %v4142_v13  ;;  %v4198_v12 = vcombine.high %v177_v9, %v181_v10  ;;  %v184_v13 = vld [vmem:[#allocation4 + $0x290] sm:$0xff]  ;;  %v233_v8 = vld [vmem:[#allocation4 + $0x418] sm:$0xff] }
 0x140   :  { %v4203_v28 = vcombine.low %v184_v13, %v188_v14 }
 0x142   :  { %3563 = vmatpush1.bf16.msra.mxu0 %v4139_v21  ;;  %3735 = vmatpush1.bf16.msra.mxu1 %v4141_v53  ;;  %v4197_v21 = vcombine.low %v177_v9, %v181_v10  ;;  %v4204_v53 = vcombine.high %v184_v13, %v188_v14  ;;  %v237_v9 = vld [vmem:[#allocation4 + $0x438] sm:$0xff]  ;;  %v244_v13 = vld [vmem:[#allocation4 + $0x470] sm:$0xff] }
 0x143   :  { %3564 = vmatprep.subr.bf16.mxu0 %v4148_v54  ;;  %3736 = vmatprep.subr.bf16.mxu1 %v4150_v22  ;;  %v4206_v54 = vcombine.high %v185_v16, %v189_v19  ;;  %v192_v22 = vld [vmem:[#allocation4 + $0x2d0] sm:$0xff]  ;;  %v241_v14 = vld [vmem:[#allocation4 + $0x458] sm:$0xff] }
 0x144   :  { %v4211_v36 = vcombine.low %v192_v22, %v196_v24 }
 0x146   :  { %3565 = vmatpush1.bf16.msra.mxu0 %v4147_v31  ;;  %3737 = vmatpush1.bf16.msra.mxu1 %v4149_v32  ;;  %v4205_v31 = vcombine.low %v185_v16, %v189_v19  ;;  %v4212_v32 = vcombine.high %v192_v22, %v196_v24  ;;  %v245_v16 = vld [vmem:[#allocation4 + $0x478] sm:$0xff]  ;;  %v252_v22 = vld [vmem:[#allocation4 + $0x4b0] sm:$0xff] }
 0x147   :  { %3566 = vmatprep.subr.bf16.mxu0 %v4156_v33  ;;  %3738 = vmatprep.subr.bf16.mxu1 %v4158_v58  ;;  %v4214_v33 = vcombine.high %v193_v25, %v197_v26  ;;  %v200_v58 = vld [vmem:[#allocation4 + $0x310] sm:$0xff]  ;;  %v249_v24 = vld [vmem:[#allocation4 + $0x498] sm:$0xff] }
 0x148   :  { %v4219_v47 = vcombine.low %v200_v58, %v204_v17 }
 0x14a   :  { %3567 = vmatpush1.bf16.msra.mxu0 %v4155_v37  ;;  %3739 = vmatpush1.bf16.msra.mxu1 %v4157_v38  ;;  %v4213_v37 = vcombine.low %v193_v25, %v197_v26  ;;  %v4220_v38 = vcombine.high %v200_v58, %v204_v17  ;;  %v253_v25 = vld [vmem:[#allocation4 + $0x4b8] sm:$0xff]  ;;  %v260_v58 = vld [vmem:[#allocation4 + $0x4f0] sm:$0xff] }
 0x14b   :  { %3568 = vmatprep.subr.bf16.mxu0 %v4164_v39  ;;  %3740 = vmatprep.subr.bf16.mxu1 %v4166_v40  ;;  %v4222_v39 = vcombine.high %v201_v18, %v205_v34  ;;  %v208_v40 = vld [vmem:[#allocation4 + $0x350] sm:$0xff]  ;;  %v257_v17 = vld [vmem:[#allocation4 + $0x4d8] sm:$0xff] }
 0x14c   :  { %v4227_v56 = vcombine.low %v208_v40, %v212_v41 }
 0x14e   :  { %3569 = vmatpush1.bf16.msra.mxu0 %v4163_v48  ;;  %3741 = vmatpush1.bf16.msra.mxu1 %v4165_v49  ;;  %v4221_v48 = vcombine.low %v201_v18, %v205_v34  ;;  %v4228_v49 = vcombine.high %v208_v40, %v212_v41  ;;  %v261_v18 = vld [vmem:[#allocation4 + $0x4f8] sm:$0xff] }
 0x14f   :  { %3570 = vmatprep.subr.bf16.mxu0 %v4172_v29  ;;  %3742 = vmatprep.subr.bf16.mxu1 %v4174_v30  ;;  %v4230_v29 = vcombine.high %v209_v42, %v213_v44  ;;  %v216_v30 = vld [vmem:[#allocation4 + $0x390] sm:$0xff]  ;;  %v265_v40 = vld [vmem:[#allocation4 + $0x518] sm:$0xff] }
 0x150   :  { %v4235_v2 = vcombine.low %v216_v30, %v220_v50  ;;  %v269_v41 = vld [vmem:[#allocation4 + $0x538] sm:$0xff] }
 0x152   :  { %3571 = vmatpush1.bf16.msra.mxu0 %v4171_v57  ;;  %3743 = vmatpush1.bf16.msra.mxu1 %v4173_v59  ;;  %v4229_v57 = vcombine.low %v209_v42, %v213_v44  ;;  %v4236_v59 = vcombine.high %v216_v30, %v220_v50  ;;  %v4277_v44 = vcombine.low %v257_v17, %v261_v18  ;;  %v277_v30 = vld [vmem:[#allocation4 + $0x578] sm:$0xff] }
 0x153   :  { %3572 = vmatprep.subr.bf16.mxu0 %v4180_v60  ;;  %3744 = vmatprep.subr.bf16.mxu1 %v4182_v61  ;;  %v4238_v60 = vcombine.high %v217_v52, %v221_v55  ;;  %v224_v61 = vld [vmem:[#allocation4 + $0x3d0] sm:$0xff] }
 0x154   :  { %v4243_v10 = vcombine.low %v224_v61, %v228_v62 }
 0x156   :  { %3573 = vmatpush1.bf16.msra.mxu0 %v4179_v3  ;;  %3745 = vmatpush1.bf16.msra.mxu1 %v4181_v4  ;;  %v4237_v3 = vcombine.low %v217_v52, %v221_v55  ;;  %v4244_v4 = vcombine.high %v224_v61, %v228_v62  ;;  %v4285_v52 = vcombine.low %v265_v40, %v269_v41  ;;  %v285_v61 = vld [vmem:[#allocation4 + $0x5b8] sm:$0xff] }
 0x157   :  { %3574 = vmatprep.subr.bf16.mxu0 %v4188_v5  ;;  %3746 = vmatprep.subr.bf16.mxu1 %v4190_v6  ;;  %v4246_v5 = vcombine.high %v225_v63, %v229_v0  ;;  %v232_v6 = vld [vmem:[#allocation4 + $0x410] sm:$0xff] }
 0x158   :  { %v4251_v19 = vcombine.low %v232_v6, %v236_v7 }
 0x15a   :  { %3575 = vmatpush1.bf16.msra.mxu0 %v4187_v11  ;;  %3747 = vmatpush1.bf16.msra.mxu1 %v4189_v45  ;;  %v4245_v11 = vcombine.low %v225_v63, %v229_v0  ;;  %v4252_v45 = vcombine.high %v232_v6, %v236_v7  ;;  %v293_v6 = vld [vmem:[#allocation4 + $0x5f8] sm:$0xff] }
 0x15b   :  { %3576 = vmatprep.subr.bf16.mxu0 %v4196_v46  ;;  %3748 = vmatprep.subr.bf16.mxu1 %v4198_v12  ;;  %v4254_v46 = vcombine.high %v233_v8, %v237_v9  ;;  %v240_v12 = vld [vmem:[#allocation4 + $0x450] sm:$0xff] }
 0x15c   :  { %v4259_v26 = vcombine.low %v240_v12, %v244_v13 }
 0x15e   :  { %3577 = vmatpush1.bf16.msra.mxu0 %v4195_v20  ;;  %3749 = vmatpush1.bf16.msra.mxu1 %v4197_v21  ;;  %v4253_v20 = vcombine.low %v233_v8, %v237_v9  ;;  %v4260_v21 = vcombine.high %v240_v12, %v244_v13  ;;  %v301_v12 = vld [vmem:[#allocation4 + $0x638] sm:$0xff] }
 0x15f   :  { %3578 = vmatprep.subr.bf16.mxu0 %v4204_v53  ;;  %3750 = vmatprep.subr.bf16.mxu1 %v4206_v54  ;;  %v4262_v53 = vcombine.high %v241_v14, %v245_v16  ;;  %v248_v54 = vld [vmem:[#allocation4 + $0x490] sm:$0xff] }
 0x160   :  { %v4267_v34 = vcombine.low %v248_v54, %v252_v22 }
 0x162   :  { %3579 = vmatpush1.bf16.msra.mxu0 %v4203_v28  ;;  %3751 = vmatpush1.bf16.msra.mxu1 %v4205_v31  ;;  %v4261_v28 = vcombine.low %v241_v14, %v245_v16  ;;  %v4268_v31 = vcombine.high %v248_v54, %v252_v22  ;;  %v309_v54 = vld [vmem:[#allocation4 + $0x678] sm:$0xff] }
 0x163   :  { %3580 = vmatprep.subr.bf16.mxu0 %v4212_v32  ;;  %3752 = vmatprep.subr.bf16.mxu1 %v4214_v33  ;;  %v4270_v32 = vcombine.high %v249_v24, %v253_v25  ;;  %v256_v33 = vld [vmem:[#allocation4 + $0x4d0] sm:$0xff] }
 0x164   :  { %v4275_v42 = vcombine.low %v256_v33, %v260_v58 }
 0x166   :  { %3581 = vmatpush1.bf16.msra.mxu0 %v4211_v36  ;;  %3753 = vmatpush1.bf16.msra.mxu1 %v4213_v37  ;;  %v4276_v36 = vcombine.high %v256_v33, %v260_v58  ;;  %v4278_v37 = vcombine.high %v257_v17, %v261_v18  ;;  %v317_v33 = vld [vmem:[#allocation4 + $0x6b8] sm:$0xff] }
 0x167   :  { %3582 = vmatprep.subr.bf16.mxu0 %v4220_v38  ;;  %3754 = vmatprep.subr.bf16.mxu1 %v4222_v39  ;;  %v264_v38 = vld [vmem:[#allocation4 + $0x510] sm:$0xff] }
 0x168   :  { %v268_v39 = vld [vmem:[#allocation4 + $0x530] sm:$0xff] }
 0x169   :  { %v4283_v50 = vcombine.low %v264_v38, %v268_v39 }
 0x16a   :  { %3583 = vmatpush1.bf16.msra.mxu0 %v4219_v47  ;;  %3755 = vmatpush1.bf16.msra.mxu1 %v4221_v48  ;;  %v4284_v47 = vcombine.high %v264_v38, %v268_v39  ;;  %v272_v48 = vld [vmem:[#allocation4 + $0x550] sm:$0xff]  ;;  %v325_v38 = vld [vmem:[#allocation4 + $0x6f8] sm:$0xff] }
 0x16b   :  { %3584 = vmatprep.subr.bf16.mxu0 %v4228_v49  ;;  %3756 = vmatprep.subr.bf16.mxu1 %v4230_v29  ;;  %v276_v49 = vld [vmem:[#allocation4 + $0x570] sm:$0xff]  ;;  %v273_v29 = vld [vmem:[#allocation4 + $0x558] sm:$0xff] }
 0x16c   :  { %v4292_v55 = vcombine.high %v272_v48, %v276_v49  ;;  %v4291_v62 = vcombine.low %v272_v48, %v276_v49  ;;  %v4293_v63 = vcombine.low %v273_v29, %v277_v30  ;;  %v333_v48 = vld [vmem:[#allocation4 + $0x738] sm:$0xff] }
 0x16e   :  { %3585 = vmatpush1.bf16.msra.mxu0 %v4227_v56  ;;  %3757 = vmatpush1.bf16.msra.mxu1 %v4229_v57  ;;  %v4294_v56 = vcombine.high %v273_v29, %v277_v30  ;;  %v280_v57 = vld [vmem:[#allocation4 + $0x590] sm:$0xff] }
 0x16f   :  { %3586 = vmatprep.subr.bf16.mxu0 %v4236_v59  ;;  %3758 = vmatprep.subr.bf16.mxu1 %v4238_v60  ;;  %v284_v59 = vld [vmem:[#allocation4 + $0x5b0] sm:$0xff]  ;;  %v281_v60 = vld [vmem:[#allocation4 + $0x598] sm:$0xff] }
 0x170   :  { %v4300_v0 = vcombine.high %v280_v57, %v284_v59  ;;  %v4299_v7 = vcombine.low %v280_v57, %v284_v59  ;;  %v4301_v8 = vcombine.low %v281_v60, %v285_v61  ;;  %v341_v57 = vld [vmem:[#allocation4 + $0x778] sm:$0xff] }
 0x172   :  { %3587 = vmatpush1.bf16.msra.mxu0 %v4235_v2  ;;  %3759 = vmatpush1.bf16.msra.mxu1 %v4237_v3  ;;  %v4302_v2 = vcombine.high %v281_v60, %v285_v61  ;;  %v288_v3 = vld [vmem:[#allocation4 + $0x5d0] sm:$0xff] }
 0x173   :  { %3588 = vmatprep.subr.bf16.mxu0 %v4244_v4  ;;  %3760 = vmatprep.subr.bf16.mxu1 %v4246_v5  ;;  %v292_v4 = vld [vmem:[#allocation4 + $0x5f0] sm:$0xff]  ;;  %v289_v5 = vld [vmem:[#allocation4 + $0x5d8] sm:$0xff] }
 0x174   :  { %v4308_v9 = vcombine.high %v288_v3, %v292_v4  ;;  %v4307_v13 = vcombine.low %v288_v3, %v292_v4  ;;  %v4309_v14 = vcombine.low %v289_v5, %v293_v6  ;;  %v349_v3 = vld [vmem:[#allocation4 + $0x7b8] sm:$0xff] }
 0x176   :  { %3589 = vmatpush1.bf16.msra.mxu0 %v4243_v10  ;;  %3761 = vmatpush1.bf16.msra.mxu1 %v4245_v11  ;;  %v4310_v10 = vcombine.high %v289_v5, %v293_v6  ;;  %v296_v11 = vld [vmem:[#allocation4 + $0x610] sm:$0xff] }
 0x177   :  { %3601 = vmatprep.subr.bf16.mxu0 %v4252_v45  ;;  %3773 = vmatprep.subr.bf16.mxu1 %v4254_v46  ;;  %v300_v45 = vld [vmem:[#allocation4 + $0x630] sm:$0xff]  ;;  %v297_v46 = vld [vmem:[#allocation4 + $0x618] sm:$0xff] }
 0x178   :  { %v4316_v16 = vcombine.high %v296_v11, %v300_v45  ;;  %v4315_v22 = vcombine.low %v296_v11, %v300_v45  ;;  %v357_v11 = vld [vmem:[#allocation4 + $0x7f8] sm:$0xff] }
 0x179   :  { %3591 = vmatmul.mubr.bf16.vlgmr.msra.gmra.mrb[4].mxu0 %v4860_v15  ;;  %3763 = vmatmul.mubr.bf16.vlgmr.msra.gmra.mrb[4].mxu1 %v4860_v15  ;;  %v4269_v15 = vcombine.low %v249_v24, %v253_v25  ;;  %v4317_v24 = vcombine.low %v297_v46, %v301_v12 }
 0x17a   :  { %3602 = vmatpush1.bf16.msra.mxu0 %v4251_v19  ;;  %3774 = vmatpush1.bf16.msra.mxu1 %v4253_v20  ;;  %v4318_v19 = vcombine.high %v297_v46, %v301_v12  ;;  %v304_v20 = vld [vmem:[#allocation4 + $0x650] sm:$0xff] }
 0x17b   :  { %3603 = vmatprep.subr.bf16.mxu0 %v4260_v21  ;;  %3775 = vmatprep.subr.bf16.mxu1 %v4262_v53  ;;  %v308_v21 = vld [vmem:[#allocation4 + $0x670] sm:$0xff]  ;;  %v305_v53 = vld [vmem:[#allocation4 + $0x658] sm:$0xff] }
 0x17c   :  { %3633 = vmatprep.mubr.bf16.mxu0 %v4874_v23  ;;  %3805 = vmatprep.mubr.bf16.mxu1 %v4874_v23  ;;  %v4286_v23 = vcombine.high %v265_v40, %v269_v41  ;;  %v4324_v25 = vcombine.high %v304_v20, %v308_v21  ;;  %v4323_v58 = vcombine.low %v304_v20, %v308_v21  ;;  %v365_v20 = vld [vmem:[#allocation4 + $0x838] sm:$0xff] }
 0x17d   :  { %v4325_v17 = vcombine.low %v305_v53, %v309_v54 }
 0x17e   :  { %3604 = vmatpush1.bf16.msra.mxu0 %v4259_v26  ;;  %3776 = vmatpush1.bf16.msra.mxu1 %v4261_v28  ;;  %v4326_v26 = vcombine.high %v305_v53, %v309_v54  ;;  %v312_v28 = vld [vmem:[#allocation4 + $0x690] sm:$0xff] }
 0x17f   :  { %3605 = vmatprep.subr.bf16.mxu0 %v4268_v31  ;;  %3777 = vmatprep.subr.bf16.mxu1 %v4270_v32  ;;  %v316_v31 = vld [vmem:[#allocation4 + $0x6b0] sm:$0xff]  ;;  %v313_v32 = vld [vmem:[#allocation4 + $0x698] sm:$0xff] }
 0x180   :  { %v4332_v18 = vcombine.high %v312_v28, %v316_v31  ;;  %v4331_v39 = vcombine.low %v312_v28, %v316_v31  ;;  %v4333_v40 = vcombine.low %v313_v32, %v317_v33  ;;  %v373_v28 = vld [vmem:[#allocation4 + $0x878] sm:$0xff] }
 0x182   :  { %3606 = vmatpush1.bf16.msra.mxu0 %v4267_v34  ;;  %3778 = vmatpush1.bf16.msra.mxu1 %v4269_v15  ;;  %v4334_v34 = vcombine.high %v313_v32, %v317_v33  ;;  %v320_v15 = vld [vmem:[#allocation4 + $0x6d0] sm:$0xff] }
 0x183   :  { %3607 = vmatprep.subr.bf16.mxu0 %v4276_v36  ;;  %3779 = vmatprep.subr.bf16.mxu1 %v4278_v37  ;;  %v324_v36 = vld [vmem:[#allocation4 + $0x6f0] sm:$0xff]  ;;  %v321_v37 = vld [vmem:[#allocation4 + $0x6d8] sm:$0xff] }
 0x184   :  { %v4340_v41 = vcombine.high %v320_v15, %v324_v36  ;;  %v4339_v49 = vcombine.low %v320_v15, %v324_v36  ;;  %v4341_v29 = vcombine.low %v321_v37, %v325_v38  ;;  %v381_v15 = vld [vmem:[#allocation4 + $0x8b8] sm:$0xff] }
 0x186   :  { %3608 = vmatpush1.bf16.msra.mxu0 %v4275_v42  ;;  %3780 = vmatpush1.bf16.msra.mxu1 %v4277_v44  ;;  %v4342_v42 = vcombine.high %v321_v37, %v325_v38  ;;  %v328_v44 = vld [vmem:[#allocation4 + $0x710] sm:$0xff] }
 0x187   :  { %3609 = vmatprep.subr.bf16.mxu0 %v4284_v47  ;;  %3781 = vmatprep.subr.bf16.mxu1 %v4286_v23  ;;  %v332_v47 = vld [vmem:[#allocation4 + $0x730] sm:$0xff]  ;;  %v329_v23 = vld [vmem:[#allocation4 + $0x718] sm:$0xff] }
 0x188   :  { %v4348_v30 = vcombine.high %v328_v44, %v332_v47  ;;  %v4347_v59 = vcombine.low %v328_v44, %v332_v47  ;;  %v4349_v60 = vcombine.low %v329_v23, %v333_v48  ;;  %v389_v44 = vld [vmem:[#allocation4 + $0x8f8] sm:$0xff] }
 0x18a   :  { %3610 = vmatpush1.bf16.msra.mxu0 %v4283_v50  ;;  %3782 = vmatpush1.bf16.msra.mxu1 %v4285_v52  ;;  %v4350_v50 = vcombine.high %v329_v23, %v333_v48  ;;  %v336_v52 = vld [vmem:[#allocation4 + $0x750] sm:$0xff] }
 0x18b   :  { %3611 = vmatprep.subr.bf16.mxu0 %v4292_v55  ;;  %3783 = vmatprep.subr.bf16.mxu1 %v4294_v56  ;;  %v340_v55 = vld [vmem:[#allocation4 + $0x770] sm:$0xff]  ;;  %v337_v56 = vld [vmem:[#allocation4 + $0x758] sm:$0xff] }
 0x18c   :  { %v4356_v61 = vcombine.high %v336_v52, %v340_v55  ;;  %v4355_v4 = vcombine.low %v336_v52, %v340_v55  ;;  %v4357_v5 = vcombine.low %v337_v56, %v341_v57 }
 0x18e   :  { %3612 = vmatpush1.bf16.msra.mxu0 %v4291_v62  ;;  %3784 = vmatpush1.bf16.msra.mxu1 %v4293_v63  ;;  %v4358_v62 = vcombine.high %v337_v56, %v341_v57  ;;  %v344_v63 = vld [vmem:[#allocation4 + $0x790] sm:$0xff] }
 0x18f   :  { %3613 = vmatprep.subr.bf16.mxu0 %v4300_v0  ;;  %3785 = vmatprep.subr.bf16.mxu1 %v4302_v2  ;;  %v348_v0 = vld [vmem:[#allocation4 + $0x7b0] sm:$0xff]  ;;  %v345_v2 = vld [vmem:[#allocation4 + $0x798] sm:$0xff] }
 0x190   :  { %v4364_v6 = vcombine.high %v344_v63, %v348_v0  ;;  %v4363_v45 = vcombine.low %v344_v63, %v348_v0  ;;  %v4365_v46 = vcombine.low %v345_v2, %v349_v3  ;;  %v400_v57 = vld [vmem:[#allocation4 + $0x950] sm:$0xff] }
 0x192   :  { %3614 = vmatpush1.bf16.msra.mxu0 %v4299_v7  ;;  %3786 = vmatpush1.bf16.msra.mxu1 %v4301_v8  ;;  %v4366_v7 = vcombine.high %v345_v2, %v349_v3  ;;  %v352_v8 = vld [vmem:[#allocation4 + $0x7d0] sm:$0xff] }
 0x193   :  { %3615 = vmatprep.subr.bf16.mxu0 %v4308_v9  ;;  %3787 = vmatprep.subr.bf16.mxu1 %v4310_v10  ;;  %v356_v9 = vld [vmem:[#allocation4 + $0x7f0] sm:$0xff]  ;;  %v353_v10 = vld [vmem:[#allocation4 + $0x7d8] sm:$0xff] }
 0x194   :  { %v4372_v12 = vcombine.high %v352_v8, %v356_v9  ;;  %v4371_v21 = vcombine.low %v352_v8, %v356_v9  ;;  %v4373_v53 = vcombine.low %v353_v10, %v357_v11  ;;  %v408_v3 = vld [vmem:[#allocation4 + $0x990] sm:$0xff] }
 0x196   :  { %3616 = vmatpush1.bf16.msra.mxu0 %v4307_v13  ;;  %3788 = vmatpush1.bf16.msra.mxu1 %v4309_v14  ;;  %v4374_v13 = vcombine.high %v353_v10, %v357_v11  ;;  %v360_v14 = vld [vmem:[#allocation4 + $0x810] sm:$0xff] }
 0x197   :  { %3617 = vmatprep.subr.bf16.mxu0 %v4316_v16  ;;  %3789 = vmatprep.subr.bf16.mxu1 %v4318_v19  ;;  %v364_v16 = vld [vmem:[#allocation4 + $0x830] sm:$0xff]  ;;  %v361_v19 = vld [vmem:[#allocation4 + $0x818] sm:$0xff] }
 0x198   :  { %v4380_v54 = vcombine.high %v360_v14, %v364_v16  ;;  %v4379_v31 = vcombine.low %v360_v14, %v364_v16  ;;  %v4381_v32 = vcombine.low %v361_v19, %v365_v20  ;;  %v416_v11 = vld [vmem:[#allocation4 + $0x9d0] sm:$0xff] }
 0x19a   :  { %3618 = vmatpush1.bf16.msra.mxu0 %v4315_v22  ;;  %3790 = vmatpush1.bf16.msra.mxu1 %v4317_v24  ;;  %v4382_v22 = vcombine.high %v361_v19, %v365_v20  ;;  %v368_v24 = vld [vmem:[#allocation4 + $0x850] sm:$0xff] }
 0x19b   :  { %3619 = vmatprep.subr.bf16.mxu0 %v4324_v25  ;;  %3791 = vmatprep.subr.bf16.mxu1 %v4326_v26  ;;  %v372_v25 = vld [vmem:[#allocation4 + $0x870] sm:$0xff]  ;;  %v369_v26 = vld [vmem:[#allocation4 + $0x858] sm:$0xff] }
 0x19c   :  { %v4388_v33 = vcombine.high %v368_v24, %v372_v25  ;;  %v4387_v36 = vcombine.low %v368_v24, %v372_v25  ;;  %v4389_v37 = vcombine.low %v369_v26, %v373_v28  ;;  %v424_v20 = vld [vmem:[#allocation4 + $0xa10] sm:$0xff] }
 0x19e   :  { %3620 = vmatpush1.bf16.msra.mxu0 %v4323_v58  ;;  %3792 = vmatpush1.bf16.msra.mxu1 %v4325_v17  ;;  %v4390_v58 = vcombine.high %v369_v26, %v373_v28  ;;  %v376_v17 = vld [vmem:[#allocation4 + $0x890] sm:$0xff] }
 0x19f   :  { %3621 = vmatprep.subr.bf16.mxu0 %v4332_v18  ;;  %3793 = vmatprep.subr.bf16.mxu1 %v4334_v34  ;;  %v380_v18 = vld [vmem:[#allocation4 + $0x8b0] sm:$0xff]  ;;  %v377_v34 = vld [vmem:[#allocation4 + $0x898] sm:$0xff] }
 0x1a0   :  { %v4396_v38 = vcombine.high %v376_v17, %v380_v18  ;;  %v4395_v47 = vcombine.low %v376_v17, %v380_v18  ;;  %v432_v28 = vld [vmem:[#allocation4 + $0xa50] sm:$0xff] }
 0x1a2   :  { %3622 = vmatpush1.bf16.msra.mxu0 %v4331_v39  ;;  %3794 = vmatpush1.bf16.msra.mxu1 %v4333_v40  ;;  %v4398_v39 = vcombine.high %v377_v34, %v381_v15  ;;  %v384_v40 = vld [vmem:[#allocation4 + $0x8d0] sm:$0xff] }
 0x1a3   :  { %3623 = vmatprep.subr.bf16.mxu0 %v4340_v41  ;;  %3795 = vmatprep.subr.bf16.mxu1 %v4342_v42  ;;  %v388_v41 = vld [vmem:[#allocation4 + $0x8f0] sm:$0xff]  ;;  %v385_v42 = vld [vmem:[#allocation4 + $0x8d8] sm:$0xff] }
 0x1a4   :  { %v4404_v23 = vcombine.high %v384_v40, %v388_v41  ;;  %v4406_v48 = vcombine.high %v385_v42, %v389_v44  ;;  %v4403_v52 = vcombine.low %v384_v40, %v388_v41  ;;  %v4405_v55 = vcombine.low %v385_v42, %v389_v44  ;;  %v448_v44 = vld [vmem:[#allocation4 + $0xad0] sm:$0xff] }
 0x1a6   :  { %3624 = vmatpush1.bf16.msra.mxu0 %v4339_v49  ;;  %3796 = vmatpush1.bf16.msra.mxu1 %v4341_v29  ;;  %v392_v49 = vld [vmem:[#allocation4 + $0x910] sm:$0xff] }
 0x1a7   :  { %3625 = vmatprep.subr.bf16.mxu0 %v4348_v30  ;;  %3797 = vmatprep.subr.bf16.mxu1 %v4350_v50  ;;  %v396_v29 = vld [vmem:[#allocation4 + $0x930] sm:$0xff]  ;;  %v393_v30 = vld [vmem:[#allocation4 + $0x918] sm:$0xff] }
 0x1a8   :  { %v397_v50 = vld [vmem:[#allocation4 + $0x938] sm:$0xff]  ;;  %v4412_v56 = vcombine.high %v392_v49, %v396_v29 }
 0x1a9   :  { %v4413_v63 = vcombine.low %v393_v30, %v397_v50 }
 0x1aa   :  { %3626 = vmatpush1.bf16.msra.mxu0 %v4347_v59  ;;  %3798 = vmatpush1.bf16.msra.mxu1 %v4349_v60  ;;  %v404_v59 = vld [vmem:[#allocation4 + $0x970] sm:$0xff]  ;;  %v401_v60 = vld [vmem:[#allocation4 + $0x958] sm:$0xff] }
 0x1ab   :  { %3627 = vmatprep.subr.bf16.mxu0 %v4356_v61  ;;  %3799 = vmatprep.subr.bf16.mxu1 %v4358_v62  ;;  %v405_v61 = vld [vmem:[#allocation4 + $0x978] sm:$0xff]  ;;  %v4411_v62 = vcombine.low %v392_v49, %v396_v29  ;;  %v4420_v0 = vcombine.high %v400_v57, %v404_v59 }
 0x1ac   :  { %v4422_v2 = vcombine.high %v401_v60, %v405_v61  ;;  %v4421_v8 = vcombine.low %v401_v60, %v405_v61  ;;  %v464_v61 = vld [vmem:[#allocation4 + $0xb50] sm:$0xff] }
 0x1ae   :  { %3628 = vmatpush1.bf16.msra.mxu0 %v4355_v4  ;;  %3800 = vmatpush1.bf16.msra.mxu1 %v4357_v5  ;;  %v412_v4 = vld [vmem:[#allocation4 + $0x9b0] sm:$0xff]  ;;  %v409_v5 = vld [vmem:[#allocation4 + $0x998] sm:$0xff] }
 0x1af   :  { %3629 = vmatprep.subr.bf16.mxu0 %v4364_v6  ;;  %3801 = vmatprep.subr.bf16.mxu1 %v4366_v7  ;;  %v413_v6 = vld [vmem:[#allocation4 + $0x9b8] sm:$0xff]  ;;  %v4419_v7 = vcombine.low %v400_v57, %v404_v59  ;;  %v4428_v9 = vcombine.high %v408_v3, %v412_v4 }
 0x1b0   :  { %v4430_v10 = vcombine.high %v409_v5, %v413_v6  ;;  %v4429_v14 = vcombine.low %v409_v5, %v413_v6  ;;  %v472_v6 = vld [vmem:[#allocation4 + $0xb90] sm:$0xff] }
 0x1b2   :  { %3630 = vmatpush1.bf16.msra.mxu0 %v4363_v45  ;;  %3802 = vmatpush1.bf16.msra.mxu1 %v4365_v46  ;;  %v420_v45 = vld [vmem:[#allocation4 + $0x9f0] sm:$0xff]  ;;  %v417_v46 = vld [vmem:[#allocation4 + $0x9d8] sm:$0xff] }
 0x1b3   :  { %3631 = vmatprep.subr.bf16.mxu0 %v4372_v12  ;;  %3803 = vmatprep.subr.bf16.mxu1 %v4374_v13  ;;  %v421_v12 = vld [vmem:[#allocation4 + $0x9f8] sm:$0xff]  ;;  %v4427_v13 = vcombine.low %v408_v3, %v412_v4  ;;  %v4436_v16 = vcombine.high %v416_v11, %v420_v45 }
 0x1b4   :  { %v4438_v19 = vcombine.high %v417_v46, %v421_v12  ;;  %v4437_v24 = vcombine.low %v417_v46, %v421_v12  ;;  %v480_v12 = vld [vmem:[#allocation4 + $0xbd0] sm:$0xff] }
 0x1b6   :  { %3632 = vmatpush1.bf16.msra.mxu0 %v4371_v21  ;;  %3804 = vmatpush1.bf16.msra.mxu1 %v4373_v53  ;;  %v428_v21 = vld [vmem:[#allocation4 + $0xa30] sm:$0xff]  ;;  %v425_v53 = vld [vmem:[#allocation4 + $0xa18] sm:$0xff] }
 0x1b7   :  { %3644 = vmatprep.subr.bf16.mxu0 %v4380_v54  ;;  %3816 = vmatprep.subr.bf16.mxu1 %v4382_v22  ;;  %v429_v54 = vld [vmem:[#allocation4 + $0xa38] sm:$0xff]  ;;  %v4435_v22 = vcombine.low %v416_v11, %v420_v45  ;;  %v4444_v25 = vcombine.high %v424_v20, %v428_v21 }
 0x1b8   :  { %v4446_v26 = vcombine.high %v425_v53, %v429_v54  ;;  %v4445_v17 = vcombine.low %v425_v53, %v429_v54  ;;  %v488_v54 = vld [vmem:[#allocation4 + $0xc10] sm:$0xff] }
 0x1b9   :  { %3634 = vmatmul.mubr.bf16.vlgmr.msra.gmra.mrb[4].mxu0 %v4882_v27  ;;  %3806 = vmatmul.mubr.bf16.vlgmr.msra.gmra.mrb[4].mxu1 %v4882_v27  ;;  %v4397_v27 = vcombine.low %v377_v34, %v381_v15  ;;  %v440_v15 = vld [vmem:[#allocation4 + $0xa90] sm:$0xff] }
 0x1ba   :  { %3645 = vmatpush1.bf16.msra.mxu0 %v4379_v31  ;;  %3817 = vmatpush1.bf16.msra.mxu1 %v4381_v32  ;;  %v436_v31 = vld [vmem:[#allocation4 + $0xa70] sm:$0xff]  ;;  %v433_v32 = vld [vmem:[#allocation4 + $0xa58] sm:$0xff] }
 0x1bb   :  { %3646 = vmatprep.subr.bf16.mxu0 %v4388_v33  ;;  %3818 = vmatprep.subr.bf16.mxu1 %v4390_v58  ;;  %v437_v33 = vld [vmem:[#allocation4 + $0xa78] sm:$0xff]  ;;  %v4443_v58 = vcombine.low %v424_v20, %v428_v21  ;;  %v4452_v18 = vcombine.high %v432_v28, %v436_v31 }
 0x1bc   :  { %3676 = vmatprep.mubr.bf16.mxu0 %v4896_v35  ;;  %3848 = vmatprep.mubr.bf16.mxu1 %v4896_v35  ;;  %v4414_v35 = vcombine.high %v393_v30, %v397_v50  ;;  %v4454_v34 = vcombine.high %v433_v32, %v437_v33  ;;  %v4453_v40 = vcombine.low %v433_v32, %v437_v33  ;;  %v456_v50 = vld [vmem:[#allocation4 + $0xb10] sm:$0xff] }
 0x1bd   :  { %v496_v33 = vld [vmem:[#allocation4 + $0xc50] sm:$0xff] }
 0x1be   :  { %3647 = vmatpush1.bf16.msra.mxu0 %v4387_v36  ;;  %3819 = vmatpush1.bf16.msra.mxu1 %v4389_v37  ;;  %v444_v36 = vld [vmem:[#allocation4 + $0xab0] sm:$0xff]  ;;  %v441_v37 = vld [vmem:[#allocation4 + $0xa98] sm:$0xff] }
 0x1bf   :  { %3648 = vmatprep.subr.bf16.mxu0 %v4396_v38  ;;  %3820 = vmatprep.subr.bf16.mxu1 %v4398_v39  ;;  %v445_v38 = vld [vmem:[#allocation4 + $0xab8] sm:$0xff]  ;;  %v4451_v39 = vcombine.low %v432_v28, %v436_v31  ;;  %v4460_v41 = vcombine.high %v440_v15, %v444_v36 }
 0x1c0   :  { %v4462_v42 = vcombine.high %v441_v37, %v445_v38  ;;  %v4461_v49 = vcombine.low %v441_v37, %v445_v38  ;;  %v504_v38 = vld [vmem:[#allocation4 + $0xc90] sm:$0xff] }
 0x1c2   :  { %3649 = vmatpush1.bf16.msra.mxu0 %v4395_v47  ;;  %3821 = vmatpush1.bf16.msra.mxu1 %v4397_v27  ;;  %v452_v47 = vld [vmem:[#allocation4 + $0xaf0] sm:$0xff]  ;;  %v449_v27 = vld [vmem:[#allocation4 + $0xad8] sm:$0xff] }
 0x1c3   :  { %3650 = vmatprep.subr.bf16.mxu0 %v4404_v23  ;;  %3822 = vmatprep.subr.bf16.mxu1 %v4406_v48  ;;  %v453_v23 = vld [vmem:[#allocation4 + $0xaf8] sm:$0xff]  ;;  %v4459_v48 = vcombine.low %v440_v15, %v444_v36  ;;  %v4468_v29 = vcombine.high %v448_v44, %v452_v47 }
 0x1c4   :  { %v4470_v30 = vcombine.high %v449_v27, %v453_v23  ;;  %v4469_v57 = vcombine.low %v449_v27, %v453_v23  ;;  %v512_v23 = vld [vmem:[#allocation4 + $0xcd0] sm:$0xff] }
 0x1c6   :  { %3651 = vmatpush1.bf16.msra.mxu0 %v4403_v52  ;;  %3823 = vmatpush1.bf16.msra.mxu1 %v4405_v55  ;;  %v460_v52 = vld [vmem:[#allocation4 + $0xb30] sm:$0xff]  ;;  %v457_v55 = vld [vmem:[#allocation4 + $0xb18] sm:$0xff] }
 0x1c7   :  { %3652 = vmatprep.subr.bf16.mxu0 %v4412_v56  ;;  %3824 = vmatprep.subr.bf16.mxu1 %v4414_v35  ;;  %v461_v56 = vld [vmem:[#allocation4 + $0xb38] sm:$0xff]  ;;  %v4467_v35 = vcombine.low %v448_v44, %v452_v47  ;;  %v4476_v59 = vcombine.high %v456_v50, %v460_v52 }
 0x1c8   :  { %v4478_v60 = vcombine.high %v457_v55, %v461_v56  ;;  %v4477_v3 = vcombine.low %v457_v55, %v461_v56  ;;  %v520_v56 = vld [vmem:[#allocation4 + $0xd10] sm:$0xff] }
 0x1ca   :  { %3653 = vmatpush1.bf16.msra.mxu0 %v4411_v62  ;;  %3825 = vmatpush1.bf16.msra.mxu1 %v4413_v63  ;;  %v468_v62 = vld [vmem:[#allocation4 + $0xb70] sm:$0xff]  ;;  %v465_v63 = vld [vmem:[#allocation4 + $0xb58] sm:$0xff] }
 0x1cb   :  { %3654 = vmatprep.subr.bf16.mxu0 %v4420_v0  ;;  %3826 = vmatprep.subr.bf16.mxu1 %v4422_v2  ;;  %v469_v0 = vld [vmem:[#allocation4 + $0xb78] sm:$0xff]  ;;  %v4475_v2 = vcombine.low %v456_v50, %v460_v52  ;;  %v4484_v4 = vcombine.high %v464_v61, %v468_v62 }
 0x1cc   :  { %v4486_v5 = vcombine.high %v465_v63, %v469_v0  ;;  %v4485_v11 = vcombine.low %v465_v63, %v469_v0  ;;  %v528_v0 = vld [vmem:[#allocation4 + $0xd50] sm:$0xff] }
 0x1ce   :  { %3655 = vmatpush1.bf16.msra.mxu0 %v4419_v7  ;;  %3827 = vmatpush1.bf16.msra.mxu1 %v4421_v8  ;;  %v476_v7 = vld [vmem:[#allocation4 + $0xbb0] sm:$0xff]  ;;  %v473_v8 = vld [vmem:[#allocation4 + $0xb98] sm:$0xff] }
 0x1cf   :  { %3656 = vmatprep.subr.bf16.mxu0 %v4428_v9  ;;  %3828 = vmatprep.subr.bf16.mxu1 %v4430_v10  ;;  %v477_v9 = vld [vmem:[#allocation4 + $0xbb8] sm:$0xff]  ;;  %v4483_v10 = vcombine.low %v464_v61, %v468_v62  ;;  %v4492_v45 = vcombine.high %v472_v6, %v476_v7 }
 0x1d0   :  { %v4494_v46 = vcombine.high %v473_v8, %v477_v9  ;;  %v4493_v20 = vcombine.low %v473_v8, %v477_v9 }
 0x1d2   :  { %3657 = vmatpush1.bf16.msra.mxu0 %v4427_v13  ;;  %3829 = vmatpush1.bf16.msra.mxu1 %v4429_v14  ;;  %v484_v13 = vld [vmem:[#allocation4 + $0xbf0] sm:$0xff]  ;;  %v481_v14 = vld [vmem:[#allocation4 + $0xbd8] sm:$0xff] }
 0x1d3   :  { %3658 = vmatprep.subr.bf16.mxu0 %v4436_v16  ;;  %3830 = vmatprep.subr.bf16.mxu1 %v4438_v19  ;;  %v485_v16 = vld [vmem:[#allocation4 + $0xbf8] sm:$0xff]  ;;  %v4491_v19 = vcombine.low %v472_v6, %v476_v7  ;;  %v4500_v21 = vcombine.high %v480_v12, %v484_v13  ;;  %v4947_v7 = vld [vmem:[#allocation6] sm:$0xff] }
 0x1d4   :  { %v4502_v53 = vcombine.high %v481_v14, %v485_v16  ;;  %v4501_v28 = vcombine.low %v481_v14, %v485_v16  ;;  %v540_v14 = vld [vmem:[#allocation4 + $0xdb0] sm:$0xff] }
 0x1d6   :  { %3659 = vmatpush1.bf16.msra.mxu0 %v4435_v22  ;;  %3831 = vmatpush1.bf16.msra.mxu1 %v4437_v24  ;;  %v492_v22 = vld [vmem:[#allocation4 + $0xc30] sm:$0xff]  ;;  %v489_v24 = vld [vmem:[#allocation4 + $0xc18] sm:$0xff] }
 0x1d7   :  { %3660 = vmatprep.subr.bf16.mxu0 %v4444_v25  ;;  %3832 = vmatprep.subr.bf16.mxu1 %v4446_v26  ;;  %v493_v25 = vld [vmem:[#allocation4 + $0xc38] sm:$0xff]  ;;  %v4499_v26 = vcombine.low %v480_v12, %v484_v13  ;;  %v4508_v31 = vcombine.high %v488_v54, %v492_v22  ;;  %v536_v13 = vld [vmem:[#allocation4 + $0xd90] sm:$0xff] }
 0x1d8   :  { %v4510_v32 = vcombine.high %v489_v24, %v493_v25  ;;  %v4509_v15 = vcombine.low %v489_v24, %v493_v25  ;;  %v4556_v25 = vcombine.high %v536_v13, %v540_v14 }
 0x1da   :  { %3661 = vmatpush1.bf16.msra.mxu0 %v4443_v58  ;;  %3833 = vmatpush1.bf16.msra.mxu1 %v4445_v17  ;;  %v500_v58 = vld [vmem:[#allocation4 + $0xc70] sm:$0xff]  ;;  %v497_v17 = vld [vmem:[#allocation4 + $0xc58] sm:$0xff] }
 0x1db   :  { %3662 = vmatprep.subr.bf16.mxu0 %v4452_v18  ;;  %3834 = vmatprep.subr.bf16.mxu1 %v4454_v34  ;;  %v501_v18 = vld [vmem:[#allocation4 + $0xc78] sm:$0xff]  ;;  %v4507_v34 = vcombine.low %v488_v54, %v492_v22  ;;  %v4516_v36 = vcombine.high %v496_v33, %v500_v58 }
 0x1dc   :  { %v4518_v37 = vcombine.high %v497_v17, %v501_v18  ;;  %v4517_v44 = vcombine.low %v497_v17, %v501_v18  ;;  %v545_v17 = vld [vmem:[#allocation4 + $0xdd8] sm:$0xff] }
 0x1dd   :  { %v549_v18 = vld [vmem:[#allocation4 + $0xdf8] sm:$0xff] }
 0x1de   :  { %3663 = vmatpush1.bf16.msra.mxu0 %v4451_v39  ;;  %3835 = vmatpush1.bf16.msra.mxu1 %v4453_v40  ;;  %v508_v39 = vld [vmem:[#allocation4 + $0xcb0] sm:$0xff]  ;;  %v505_v40 = vld [vmem:[#allocation4 + $0xc98] sm:$0xff] }
 0x1df   :  { %3664 = vmatprep.subr.bf16.mxu0 %v4460_v41  ;;  %3836 = vmatprep.subr.bf16.mxu1 %v4462_v42  ;;  %v509_v41 = vld [vmem:[#allocation4 + $0xcb8] sm:$0xff]  ;;  %v4515_v42 = vcombine.low %v496_v33, %v500_v58  ;;  %v4524_v47 = vcombine.high %v504_v38, %v508_v39  ;;  %v4523_v50 = vcombine.low %v504_v38, %v508_v39 }
 0x1e0   :  { %v4526_v27 = vcombine.high %v505_v40, %v509_v41  ;;  %v4555_v39 = vcombine.low %v536_v13, %v540_v14  ;;  %v561_v13 = vld [vmem:[#allocation4 + $0xe58] sm:$0xff] }
 0x1e1   :  { %v565_v14 = vld [vmem:[#allocation4 + $0xe78] sm:$0xff] }
 0x1e2   :  { %3665 = vmatpush1.bf16.msra.mxu0 %v4459_v48  ;;  %3837 = vmatpush1.bf16.msra.mxu1 %v4461_v49  ;;  %v516_v48 = vld [vmem:[#allocation4 + $0xcf0] sm:$0xff]  ;;  %v513_v49 = vld [vmem:[#allocation4 + $0xcd8] sm:$0xff] }
 0x1e3   :  { %3666 = vmatprep.subr.bf16.mxu0 %v4468_v29  ;;  %3838 = vmatprep.subr.bf16.mxu1 %v4470_v30  ;;  %v517_v29 = vld [vmem:[#allocation4 + $0xcf8] sm:$0xff]  ;;  %v3955_v30 = vlaneseq  ;;  %v4532_v52 = vcombine.high %v512_v23, %v516_v48  ;;  %v4531_v61 = vcombine.low %v512_v23, %v516_v48 }
 0x1e4   :  { %v4534_v55 = vcombine.high %v513_v49, %v517_v29  ;;  %v4533_v62 = vcombine.low %v513_v49, %v517_v29 }
 0x1e6   :  { %3667 = vmatpush1.bf16.msra.mxu0 %v4467_v35  ;;  %3839 = vmatpush1.bf16.msra.mxu1 %v4469_v57  ;;  %v524_v35 = vld [vmem:[#allocation4 + $0xd30] sm:$0xff]  ;;  %v521_v57 = vld [vmem:[#allocation4 + $0xd18] sm:$0xff] }
 0x1e7   :  { %3668 = vmatprep.subr.bf16.mxu0 %v4476_v59  ;;  %3840 = vmatprep.subr.bf16.mxu1 %v4478_v60  ;;  %v525_v59 = vld [vmem:[#allocation4 + $0xd38] sm:$0xff]  ;;  %v4944_v60 = vshrl.u32 %v3955_v30, 7  ;;  %v4539_v6 = vcombine.low %v520_v56, %v524_v35  ;;  %v4566_v30 = vcombine.high %v545_v17, %v549_v18 }
 0x1e8   :  { %v4542_v63 = vcombine.high %v521_v57, %v525_v59 }
 0x1e9   :  { %v3965_v8 = vsub.s32 2, %v4944_v60  ;;  %v3961_v9 = vsub.s32 1, %v4944_v60 }
 0x1ea   :  { %3669 = vmatpush1.bf16.msra.mxu0 %v4475_v2  ;;  %3841 = vmatpush1.bf16.msra.mxu1 %v4477_v3  ;;  %v532_v2 = vld [vmem:[#allocation4 + $0xd70] sm:$0xff]  ;;  %v3957_v3 = vsub.s32 0, %v4944_v60 }
 0x1eb   :  { %3670 = vmatprep.subr.bf16.mxu0 %v4484_v4  ;;  %3842 = vmatprep.subr.bf16.mxu1 %v4486_v5  ;;  %v529_v4 = vld [vmem:[#allocation4 + $0xd58] sm:$0xff]  ;;  %v4547_v54 = vcombine.low %v528_v0, %v532_v2 }
 0x1ec   :  { %v533_v5 = vld [vmem:[#allocation4 + $0xd78] sm:$0xff]  ;;  %v3958_v16 = vrot.slane %v4947_v7, %v3957_v3 }
 0x1ed   :  { %v4550_v12 = vcombine.high %v529_v4, %v533_v5  ;;  %v4549_v24 = vcombine.low %v529_v4, %v533_v5  ;;  %v4565_v4 = vcombine.low %v545_v17, %v549_v18  ;;  %v576_v18 = vld [vmem:[#allocation4 + $0xed0] sm:$0xff] }
 0x1ee   :  { %3671 = vmatpush1.bf16.msra.mxu0 %v4483_v10  ;;  %3843 = vmatpush1.bf16.msra.mxu1 %v4485_v11  ;;  %v4541_v10 = vcombine.low %v521_v57, %v525_v59  ;;  %v4548_v11 = vcombine.high %v528_v0, %v532_v2  ;;  %v556_v57 = vld [vmem:[#allocation4 + $0xe30] sm:$0xff]  ;;  %v553_v59 = vld [vmem:[#allocation4 + $0xe18] sm:$0xff] }
 0x1ef   :  { %3672 = vmatprep.subr.bf16.mxu0 %v4492_v45  ;;  %3844 = vmatprep.subr.bf16.mxu1 %v4494_v46  ;;  %v4951_v45 = vld [vmem:[#allocation8] sm:$0xff]  ;;  %v3969_v46 = vsub.s32 3, %v4944_v60 }
 0x1f0   :  { %v4016_v22 = vrot.slane %v4951_v45, %v3957_v3 }
 0x1f1   :  { %v3970_v33 = vrot.slane %v4947_v7, %v3969_v46  ;;  %v4028_v38 = vrot.slane %v4951_v45, %v3969_v46  ;;  %v560_v46 = vld [vmem:[#allocation4 + $0xe50] sm:$0xff] }
 0x1f2   :  { %3673 = vmatpush1.bf16.msra.mxu0 %v4491_v19  ;;  %3845 = vmatpush1.bf16.msra.mxu1 %v4493_v20  ;;  %v537_v19 = vld [vmem:[#allocation4 + $0xd98] sm:$0xff] }
 0x1f3   :  { %3674 = vmatprep.subr.bf16.mxu0 %v4500_v21  ;;  %3846 = vmatprep.subr.bf16.mxu1 %v4502_v53  ;;  %v541_v20 = vld [vmem:[#allocation4 + $0xdb8] sm:$0xff]  ;;  %v3966_v21 = vrot.slane %v4947_v7, %v3965_v8  ;;  %v3962_v53 = vrot.slane %v4947_v7, %v3961_v9 }
 0x1f4   :  { %v4558_v58 = vcombine.high %v537_v19, %v541_v20 }
 0x1f6   :  { %3675 = vmatpush1.bf16.msra.mxu0 %v4499_v26  ;;  %3847 = vmatpush1.bf16.msra.mxu1 %v4501_v28  ;;  %v4958_v26 = vld [vmem:[#allocation4 + $0xdd0] sm:$0xff] }
 0x1f7   :  { %3687 = vmatprep.subr.bf16.mxu0 %v4508_v31  ;;  %3859 = vmatprep.subr.bf16.mxu1 %v4510_v32  ;;  %v548_v28 = vld [vmem:[#allocation4 + $0xdf0] sm:$0xff]  ;;  %v4020_v32 = vrot.slane %v4951_v45, %v3961_v9 }
 0x1f9   :  { %3677 = vmatmul.mubr.bf16.vlgmr.msra.gmra.mrb[4].mxu0 %v4904_v43  ;;  %3849 = vmatmul.mubr.bf16.vlgmr.msra.gmra.mrb[4].mxu1 %v4904_v43  ;;  %v4525_v43 = vcombine.low %v505_v40, %v509_v41 }
 0x1fa   :  { %3688 = vmatpush1.bf16.msra.mxu0 %v4507_v34  ;;  %3860 = vmatpush1.bf16.msra.mxu1 %v4509_v15 }
 0x1fb   :  { %3689 = vmatprep.subr.bf16.mxu0 %v4516_v36  ;;  %3861 = vmatprep.subr.bf16.mxu1 %v4518_v37  ;;  %v4024_v36 = vrot.slane %v4951_v45, %v3965_v8 }
 0x1fc   :  { %3719 = vmatprep.mubr.bf16.mxu0 %v4918_v51  ;;  %3891 = vmatprep.mubr.bf16.mxu1 %v4918_v51  ;;  %v4540_v51 = vcombine.high %v520_v56, %v524_v35 }
 0x1fe   :  { %3690 = vmatpush1.bf16.msra.mxu0 %v4515_v42  ;;  %3862 = vmatpush1.bf16.msra.mxu1 %v4517_v44 }
 0x1ff   :  { %3691 = vmatprep.subr.bf16.mxu0 %v4524_v47  ;;  %3863 = vmatprep.subr.bf16.mxu1 %v4526_v27  ;;  %v4557_v47 = vcombine.low %v537_v19, %v541_v20  ;;  %v4564_v27 = vcombine.high %v4958_v26, %v548_v28 }
 0x202   :  { %3692 = vmatpush1.bf16.msra.mxu0 %v4523_v50  ;;  %3864 = vmatpush1.bf16.msra.mxu1 %v4525_v43  ;;  %v552_v50 = vld [vmem:[#allocation4 + $0xe10] sm:$0xff] }
 0x203   :  { %3693 = vmatprep.subr.bf16.mxu0 %v4532_v52  ;;  %3865 = vmatprep.subr.bf16.mxu1 %v4534_v55  ;;  %v4572_v5 = vcombine.high %v552_v50, %v556_v57 }
 0x206   :  { %3694 = vmatpush1.bf16.msra.mxu0 %v4531_v61  ;;  %3866 = vmatpush1.bf16.msra.mxu1 %v4533_v62  ;;  %v557_v61 = vld [vmem:[#allocation4 + $0xe38] sm:$0xff] }
 0x207   :  { %3695 = vmatprep.subr.bf16.mxu0 %v4540_v51  ;;  %3867 = vmatprep.subr.bf16.mxu1 %v4542_v63  ;;  %v4563_v51 = vcombine.low %v4958_v26, %v548_v28  ;;  %v572_v26 = vld [vmem:[#allocation4 + $0xeb0] sm:$0xff]  ;;  %v569_v28 = vld [vmem:[#allocation4 + $0xe98] sm:$0xff] }
 0x20a   :  { %3696 = vmatpush1.bf16.msra.mxu0 %v4539_v6  ;;  %3868 = vmatpush1.bf16.msra.mxu1 %v4541_v10  ;;  %v4574_v6 = vcombine.high %v553_v59, %v557_v61 }
 0x20b   :  { %3697 = vmatprep.subr.bf16.mxu0 %v4548_v11  ;;  %3869 = vmatprep.subr.bf16.mxu1 %v4550_v12  ;;  %v564_v12 = vld [vmem:[#allocation4 + $0xe70] sm:$0xff] }
 0x20c   :  { %v3377_v31 = vpop.f32.mrb[0].mxu0  ;;  %v3549_v15 = vpop.f32.mrb[0].mxu1 }
 0x20d   :  { %v3995_v34 = vadd.f32 %v3958_v16, %v3377_v31  ;;  %v3379_v37 = vpop.f32.mrb[1].mxu0  ;;  %v3997_v40 = vadd.f32 %v3966_v21, %v3549_v15  ;;  %v3551_v42 = vpop.f32.mrb[1].mxu1  ;;  %v573_v31 = vld [vmem:[#allocation4 + $0xeb8] sm:$0xff] }
 0x20e   :  { %v3996_v41 = vadd.f32 %v3962_v53, %v3379_v37  ;;  %v3381_v44 = vpop.f32.mrb[2].mxu0  ;;  %3698 = vmatpush1.bf16.msra.mxu0 %v4547_v54  ;;  %v3553_v49 = vpop.f32.mrb[2].mxu1  ;;  %3870 = vmatpush1.bf16.msra.mxu1 %v4549_v24  ;;  %v3998_v52 = vadd.f32 %v3970_v33, %v3551_v42  ;;  %v4580_v54 = vcombine.high %v560_v46, %v564_v12  ;;  %v577_v15 = vld [vmem:[#allocation4 + $0xed8] sm:$0xff]  ;;  %v588_v42 = vld [vmem:[#allocation4 + $0xf30] sm:$0xff] }
 0x20f   :  { %v4053_v23 = vmul.f32 %v4016_v22, %v3995_v34  ;;  %v4003_v48 = vadd.f32 %v3958_v16, %v3381_v44  ;;  %v3383_v29 = vpop.f32.mrb[3].mxu0  ;;  %3699 = vmatprep.subr.bf16.mxu0 %v4556_v25  ;;  %v4005_v55 = vadd.f32 %v3966_v21, %v3553_v49  ;;  %v3555_v35 = vpop.f32.mrb[3].mxu1  ;;  %3871 = vmatprep.subr.bf16.mxu1 %v4558_v58  ;;  %v568_v25 = vld [vmem:[#allocation4 + $0xe90] sm:$0xff]  ;;  %v585_v44 = vld [vmem:[#allocation4 + $0xf18] sm:$0xff] }
 0x210   :  { %v4054_v43 = vmul.f32 %v4020_v32, %v3996_v41  ;;  %v4004_v56 = vadd.f32 %v3962_v53, %v3383_v29  ;;  %v4055_v63 = vmul.f32 %v4024_v36, %v3997_v40  ;;  %v4006_v3 = vadd.f32 %v3970_v33, %v3555_v35  ;;  %v580_v34 = vld [vmem:[#allocation4 + $0xef0] sm:$0xff] }
 0x211   :  { %v4061_v62 = vmul.f32 %v4016_v22, %v4003_v48  ;;  %v4056_v8 = vmul.f32 %v4028_v38, %v3998_v52  ;;  %v4063_v10 = vmul.f32 %v4024_v36, %v4005_v55  ;;  %v4571_v21 = vcombine.low %v552_v50, %v556_v57  ;;  %v581_v36 = vld [vmem:[#allocation4 + $0xef8] sm:$0xff]  ;;  %v584_v41 = vld [vmem:[#allocation4 + $0xf10] sm:$0xff] }
 0x212   :  { %v4069_v0 = vadd.f32 %v4054_v43, %v4053_v23  ;;  %v4062_v2 = vmul.f32 %v4020_v32, %v4004_v56  ;;  %3700 = vmatpush1.bf16.msra.mxu0 %v4555_v39  ;;  %3872 = vmatpush1.bf16.msra.mxu1 %v4557_v47  ;;  %v4064_v19 = vmul.f32 %v4028_v38, %v4006_v3  ;;  %v589_v47 = vld [vmem:[#allocation4 + $0xf38] sm:$0xff]  ;;  %v592_v29 = vld [vmem:[#allocation4 + $0xf50] sm:$0xff] }
 0x213   :  { %3701 = vmatprep.subr.bf16.mxu0 %v4564_v27  ;;  %3873 = vmatprep.subr.bf16.mxu1 %v4566_v30  ;;  %v4573_v53 = vcombine.low %v553_v59, %v557_v61  ;;  %v4582_v24 = vcombine.high %v561_v13, %v565_v14  ;;  %v4579_v32 = vcombine.low %v560_v46, %v564_v12  ;;  %v596_v30 = vld [vmem:[#allocation4 + $0xf70] sm:$0xff]  ;;  %v593_v50 = vld [vmem:[#allocation4 + $0xf58] sm:$0xff] }
 0x214   :  { %v4070_v9 = vadd.f32 %v4069_v0, %v4055_v63  ;;  %v4078_v11 = vadd.f32 %v4062_v2, %v4061_v62  ;;  %v4581_v33 = vcombine.low %v561_v13, %v565_v14  ;;  %v4588_v58 = vcombine.high %v568_v25, %v572_v26  ;;  %v597_v43 = vld [vmem:[#allocation4 + $0xf78] sm:$0xff]  ;;  %v600_v57 = vld [vmem:[#allocation4 + $0xf90] sm:$0xff] }
 0x215   :  { %v4590_v17 = vcombine.high %v569_v28, %v573_v31  ;;  %v4587_v37 = vcombine.low %v568_v25, %v572_v26  ;;  %v4589_v38 = vcombine.low %v569_v28, %v573_v31  ;;  %v4596_v39 = vcombine.high %v576_v18, %v580_v34  ;;  %v604_v59 = vld [vmem:[#allocation4 + $0xfb0] sm:$0xff]  ;;  %v601_v61 = vld [vmem:[#allocation4 + $0xf98] sm:$0xff] }
 0x216   :  { %v4966_v16 = vadd.f32 %v4070_v9, %v4056_v8  ;;  %v4079_v20 = vadd.f32 %v4078_v11, %v4063_v10  ;;  %3702 = vmatpush1.bf16.msra.mxu0 %v4563_v51  ;;  %3874 = vmatpush1.bf16.msra.mxu1 %v4565_v4  ;;  %v4598_v40 = vcombine.high %v577_v15, %v581_v36  ;;  %v605_v62 = vld [vmem:[#allocation4 + $0xfb8] sm:$0xff]  ;;  %v608_v3 = vld [vmem:[#allocation4 + $0xfd0] sm:$0xff]  ;;  %v3973_v13 = vsub.s32 4, %v4944_v60 }
 0x217   :  { %3703 = vmatprep.subr.bf16.mxu0 %v4572_v5  ;;  %3875 = vmatprep.subr.bf16.mxu1 %v4574_v6  ;;  %v4595_v27 = vcombine.low %v576_v18, %v580_v34  ;;  %v4597_v23 = vcombine.low %v577_v15, %v581_v36  ;;  %v4604_v48 = vcombine.high %v584_v41, %v588_v42  ;;  %v612_v4 = vld [vmem:[#allocation4 + $0xff0] sm:$0xff]  ;;  %v609_v5 = vld [vmem:[#allocation4 + $0xfd8] sm:$0xff]  ;;  %v3977_v14 = vsub.s32 5, %v4944_v60 }
 0x218   :  { %v4968_v22 = vadd.f32 %v4079_v20, %v4064_v19  ;;  %v4606_v49 = vcombine.high %v585_v44, %v589_v47  ;;  %v4603_v52 = vcombine.low %v584_v41, %v588_v42  ;;  %v4605_v55 = vcombine.low %v585_v44, %v589_v47  ;;  %v613_v6 = vld [vmem:[#allocation4 + $0xff8] sm:$0xff] }
 0x219   :  { %v4612_v56 = vcombine.high %v592_v29, %v596_v30  ;;  %v4614_v35 = vcombine.high %v593_v50, %v597_v43  ;;  %v4611_v51 = vcombine.low %v592_v29, %v596_v30  ;;  %v4613_v63 = vcombine.low %v593_v50, %v597_v43 }
 0x21a   :  { %3704 = vmatpush1.bf16.msra.mxu0 %v4571_v21  ;;  %3876 = vmatpush1.bf16.msra.mxu1 %v4573_v53  ;;  %v4620_v0 = vcombine.high %v600_v57, %v604_v59  ;;  %v4622_v2 = vcombine.high %v601_v61, %v605_v62  ;;  %v4619_v8 = vcombine.low %v600_v57, %v604_v59  ;;  %v3981_v19 = vsub.s32 6, %v4944_v60 }
 0x21b   :  { %3705 = vmatprep.subr.bf16.mxu0 %v4580_v54  ;;  %3877 = vmatprep.subr.bf16.mxu1 %v4582_v24  ;;  %v4621_v9 = vcombine.low %v601_v61, %v605_v62  ;;  %v4628_v10 = vcombine.high %v608_v3, %v612_v4  ;;  %v4630_v11 = vcombine.high %v609_v5, %v613_v6  ;;  %v3985_v21 = vsub.s32 7, %v4944_v60 }
 0x21c   :  { %v4627_v46 = vcombine.low %v608_v3, %v612_v4  ;;  %v4629_v12 = vcombine.low %v609_v5, %v613_v6  ;;  %v3974_v20 = vrot.slane %v4947_v7, %v3973_v13  ;;  %v3978_v53 = vrot.slane %v4947_v7, %v3977_v14 }
 0x21d   :  { %v4032_v54 = vrot.slane %v4951_v45, %v3973_v13  ;;  %v3982_v24 = vrot.slane %v4947_v7, %v3981_v19  ;;  %v4036_v26 = vrot.slane %v4951_v45, %v3977_v14  ;;  %v4040_v60 = vrot.slane %v4951_v45, %v3981_v19 }
 0x21e   :  { %3706 = vmatpush1.bf16.msra.mxu0 %v4579_v32  ;;  %3878 = vmatpush1.bf16.msra.mxu1 %v4581_v33  ;;  %v3986_v32 = vrot.slane %v4947_v7, %v3985_v21  ;;  %v4044_v41 = vrot.slane %v4951_v45, %v3985_v21 }
 0x21f   :  { %3707 = vmatprep.subr.bf16.mxu0 %v4588_v58  ;;  %3879 = vmatprep.subr.bf16.mxu1 %v4590_v17 }
 0x222   :  { %3708 = vmatpush1.bf16.msra.mxu0 %v4587_v37  ;;  %3880 = vmatpush1.bf16.msra.mxu1 %v4589_v38 }
 0x223   :  { %3709 = vmatprep.subr.bf16.mxu0 %v4596_v39  ;;  %3881 = vmatprep.subr.bf16.mxu1 %v4598_v40 }
 0x226   :  { %3710 = vmatpush1.bf16.msra.mxu0 %v4595_v27  ;;  %3882 = vmatpush1.bf16.msra.mxu1 %v4597_v23 }
 0x227   :  { %3711 = vmatprep.subr.bf16.mxu0 %v4604_v48  ;;  %3883 = vmatprep.subr.bf16.mxu1 %v4606_v49 }
 0x22a   :  { %3712 = vmatpush1.bf16.msra.mxu0 %v4603_v52  ;;  %3884 = vmatpush1.bf16.msra.mxu1 %v4605_v55 }
 0x22b   :  { %3713 = vmatprep.subr.bf16.mxu0 %v4612_v56  ;;  %3885 = vmatprep.subr.bf16.mxu1 %v4614_v35 }
 0x22e   :  { %3714 = vmatpush1.bf16.msra.mxu0 %v4611_v51  ;;  %3886 = vmatpush1.bf16.msra.mxu1 %v4613_v63 }
 0x22f   :  { %3715 = vmatprep.subr.bf16.mxu0 %v4620_v0  ;;  %3887 = vmatprep.subr.bf16.mxu1 %v4622_v2 }
 0x232   :  { %3716 = vmatpush1.bf16.msra.mxu0 %v4619_v8  ;;  %3888 = vmatpush1.bf16.msra.mxu1 %v4621_v9 }
 0x233   :  { %3717 = vmatprep.subr.bf16.mxu0 %v4628_v10  ;;  %3889 = vmatprep.subr.bf16.mxu1 %v4630_v11 }
 0x236   :  { %3718 = vmatpush1.bf16.msra.mxu0 %v4627_v46  ;;  %3890 = vmatpush1.bf16.msra.mxu1 %v4629_v12 }
 0x239   :  { %3720 = vmatmul.mubr.bf16.vlgmr.msra.gmra.mrb[4].mxu0 %v4926_v1  ;;  %3892 = vmatmul.mubr.bf16.vlgmr.msra.gmra.mrb[4].mxu1 %v4926_v1 }
 0x30c   :  { %v3721_v25 = vpop.f32.mrb[4].mxu0  ;;  %v3893_v28 = vpop.f32.mrb[4].mxu1 }
 0x30d   :  { %v3999_v1 = vadd.f32 %v3974_v20, %v3721_v25  ;;  %v3723_v31 = vpop.f32.mrb[5].mxu0  ;;  %v3895_v58 = vpop.f32.mrb[5].mxu1  ;;  %v4001_v34 = vadd.f32 %v3982_v24, %v3893_v28 }
 0x30e   :  { %v4000_v33 = vadd.f32 %v3978_v53, %v3723_v31  ;;  %v3725_v17 = vpop.f32.mrb[6].mxu0  ;;  %v3897_v36 = vpop.f32.mrb[6].mxu1  ;;  %v4002_v44 = vadd.f32 %v3986_v32, %v3895_v58 }
 0x30f   :  { %v4057_v18 = vmul.f32 %v4032_v54, %v3999_v1  ;;  %v4007_v15 = vadd.f32 %v3974_v20, %v3725_v17  ;;  %v3727_v37 = vpop.f32.mrb[7].mxu0  ;;  %v3899_v40 = vpop.f32.mrb[7].mxu1  ;;  %v4009_v7 = vadd.f32 %v3982_v24, %v3897_v36  ;;  %v4059_v23 = vmul.f32 %v4040_v60, %v4001_v34 }
 0x310   :  { %v4058_v38 = vmul.f32 %v4036_v26, %v4000_v33  ;;  %v4008_v39 = vadd.f32 %v3978_v53, %v3727_v37  ;;  %v4010_v49 = vadd.f32 %v3986_v32, %v3899_v40  ;;  %v4060_v43 = vmul.f32 %v4044_v41, %v4002_v44 }
 0x311   :  { %v4072_v42 = vadd.f32 %v4966_v16, %v4057_v18  ;;  %v4065_v47 = vmul.f32 %v4032_v54, %v4007_v15  ;;  %v4067_v30 = vmul.f32 %v4040_v60, %v4009_v7  ;;  %v4088_v16 = vstv %s4999_s4 }
 0x312   :  { %v4066_v27 = vmul.f32 %v4036_v26, %v4008_v39  ;;  %v4068_v55 = vmul.f32 %v4044_v41, %v4010_v49 }
 0x313   :  { %v4081_v48 = vadd.f32 %v4968_v22, %v4065_v47  ;;  %v4073_v29 = vadd.f32 %v4072_v42, %v4058_v38 }
 0x315   :  { %v4082_v50 = vadd.f32 %v4081_v48, %v4066_v27  ;;  %v4074_v52 = vadd.f32 %v4073_v29, %v4059_v23 }
 0x317   :  { %v4075_v56 = vadd.f32 %v4074_v52, %v4060_v43  ;;  %v4083_v35 = vadd.f32 %v4082_v50, %v4067_v30 }
 0x319   :  { %4076 = vadd.xlane.f32.xlu0 %v4075_v56  ;;  %v4084_v45 = vadd.f32 %v4083_v35, %v4068_v55 }
 0x31d   :  { %4085 = vadd.xlane.f32.xlu0 %v4084_v45 }
 0x3a6   :  { %v4077_v57 = vpop.xlane.xlu0 %4076 }
 0x3a7   :  { %v4089_v59 = vadd.f32 %v4088_v16, %v4077_v57 }
 0x3a9   :  { %v4631_v61 = vmul.f32 -1.442695, %v4089_v59 }
 0x3aa   :  { %v4086_v22 = vpop.xlane.xlu0 %4085 }
 0x3ab   :  { %4686 = vpow2.f32 %v4631_v61  ;;  %v4090_v62 = vadd.f32 %v4088_v16, %v4086_v22 }
 0x3ad   :  { %v4632_v51 = vmul.f32 -1.442695, %v4090_v62 }
 0x3af   :  { %4688 = vpow2.f32 %v4632_v51 }
 0x3b5   :  { %v4687_v63 = vpop.eup %4686 }
 0x3b6   :  { %v4097_v0 = vadd.f32 1.0, %v4687_v63 }
 0x3b8   :  { %4690 = vrcp.f32 %v4097_v0 }
 0x3b9   :  { %v4689_v2 = vpop.eup %4688 }
 0x3ba   :  { %v4098_v3 = vadd.f32 1.0, %v4689_v2 }
 0x3bc   :  { %4692 = vrcp.f32 %v4098_v3 }
 0x3c2   :  { %v4691_v4 = vpop.eup %4690 }
 0x3c3   :  { %4103 = vst [vmem:[%s5000_s5] sm:$0xff] %v4691_v4 }
 0x3c6   :  { %v4693_v5 = vpop.eup %4692 }
 0x3c7   :  { %4104 = vst [vmem:[%s5000_s5 + $0x8] sm:$0xff] %v4693_v5 }
 0x3c8   :  { %4109 = vsyncpa [#allocation5], 1 }
 0x3c9   :  { %4110 = vsyncpa [#allocation7], 1 }

</bundles_post_ra>
